<compile_context>
chip_gen: v7x
topology: tpu7x:2x2x1
jax: 0.10.0
libtpu: 0.0.40
codegen_flags: <defaults>
</compile_context>

<pallas_src>
import jax
import jax.numpy as jnp
from jax.experimental import pallas as pl
from jax.experimental.pallas import tpu as pltpu

V = 16   # vocab (input_size)
E = 16   # embedding_size
H = 32   # hidden_size
L = 2    # num GRU layers (bidirectional => 2*L final hidden rows)
S = 8    # sentence length

H2 = 2 * H   # packed hidden width  [h_fwd | h_bwd]
H6 = 6 * H   # packed gate width    [r_f r_b z_f z_b n_f n_b]
H8 = 8 * H   # bias slab width      (gate biases + [b_hn_f | b_hn_b])


def encoder_kernel(tok_ref, table_ref, wih0_ref, wih1_ref, whh_ref, bias_ref,
                   out_ref, hid_ref, seq0_ref, seq1_ref):
    f32 = jnp.float32

    # ---------- embedding lookup as a one-hot matmul (no scalar-addressed gathers) ----------
    tok = tok_ref[...]                                                   # (S, 1) int32
    onehot = (jax.lax.broadcasted_iota(jnp.int32, (S, V), 1) == tok).astype(f32)
    emb = jnp.dot(onehot, table_ref[...], preferred_element_type=f32)    # (S, E)

    # nn.Embedding(max_norm=1): renorm rows whose L2 norm exceeds 1 (forward value only).
    sumsq = jnp.sum(emb * emb, axis=1, keepdims=True)                    # (S, 1)
    scale = jnp.where(sumsq > 1.0, jax.lax.rsqrt(sumsq), 1.0)
    emb = emb * scale

    # Time-reversal matrix: rev @ x == flip(x, axis=0).  Built once; used on the MXU.
    rev = (jax.lax.broadcasted_iota(jnp.int32, (S, S), 0)
           + jax.lax.broadcasted_iota(jnp.int32, (S, S), 1) == S - 1).astype(f32)

    def run_layer(gi, whh, b_hn, seq_ref):
        """Fused fwd+bwd GRU over S steps.
        gi   : (S, 6H)  lanes [r_f r_b z_f z_b n_f n_b]; r/z lanes already contain
               b_ih + b_hh, n lanes contain b_ih only (b_hh_n applied below).
        whh  : (2H, 6H) block-diagonal per-gate hidden->hidden slab.
        b_hn : (1, 2H)  hidden bias of the n gate (kept inside r * (.) per PyTorch).
        Writes the packed hidden [h_f(time t) | h_b(time S-1-t)] to seq_ref row t;
        returns the final packed hidden state (1, 2H)."""
        h = jnp.zeros((1, H2), f32)
        for t in range(S):
            gh = jnp.dot(h, whh, preferred_element_type=f32)             # (1, 6H)
            g_t = gi[t:t + 1, :]
            r = jax.nn.sigmoid(g_t[:, 0:H2] + gh[:, 0:H2])
            z = jax.nn.sigmoid(g_t[:, H2:2 * H2] + gh[:, H2:2 * H2])
            n = jnp.tanh(g_t[:, 2 * H2:3 * H2] + r * (gh[:, 2 * H2:3 * H2] + b_hn))
            h = (1.0 - z) * n + z * h
            seq_ref[pl.ds(t, 1), :] = h           # bound live ranges: row store to VMEM
        return h

    finals = []
    x = emb                                                        # fwd-dir input at step t
    x_rev = jnp.dot(rev, emb, preferred_element_type=f32)          # bwd-dir input (time S-1-t)
    wih_refs = (wih0_ref, wih1_ref)
    seq_refs = (seq0_ref, seq1_ref)
    in_dims = (E, H2)
    for l in range(L):
        w = wih_refs[l]
        d = in_dims[l]
        # All 3 gates x 2 directions in one matmul pair; r/z hidden biases already folded in.
        gi = (jnp.dot(x, w[0:d, :], preferred_element_type=f32)
              + jnp.dot(x_rev, w[d:2 * d, :], preferred_element_type=f32)
              + bias_ref[l:l + 1, 0:H6])                           # (S, 6H)
        h = run_layer(gi, whh_ref[l, :, :], bias_ref[l:l + 1, H6:H8], seq_refs[l])
        finals.append(h)
        if l + 1 < L:
            x = seq_refs[l][...]                                   # (S, 2H), loop order
            x_rev = jnp.dot(rev, x, preferred_element_type=f32)

    # out[t] = fwd(t) + bwd(t): loop-order rows hold fwd(t) directly, bwd(t) via reversal.
    out_loop = seq_refs[L - 1][...]                                # (S, 2H)
    out_rev = jnp.dot(rev, out_loop, preferred_element_type=f32)
    out_ref[...] = out_loop[:, 0:H] + out_rev[:, H:H2]
    # Packed final hiddens [l, (fwd|bwd)]; reshaped to (2L, H) host-side -> PyTorch order.
    hid_ref[...] = jnp.concatenate(finals, axis=0)


# -------------------------------------------------------------------------
# parameters (PyTorch nn.GRU layout) + host-side packing into kernel slabs
# -------------------------------------------------------------------------
def make_params(key):
    s = 0.1
    keys = jax.random.split(key, 1 + L * 2 * 4)
    p = {"embedding": jax.random.normal(keys[0], (V, E), jnp.float32)}
    i = 1
    for l in range(L):
        in_dim = E if l == 0 else 2 * H
        for d in range(2):
            p[f"w_ih_l{l}_d{d}"] = s * jax.random.normal(keys[i], (3 * H, in_dim), jnp.float32); i += 1
            p[f"w_hh_l{l}_d{d}"] = s * jax.random.normal(keys[i], (3 * H, H), jnp.float32); i += 1
            p[f"b_ih_l{l}_d{d}"] = s * jax.random.normal(keys[i], (3 * H,), jnp.float32); i += 1
            p[f"b_hh_l{l}_d{d}"] = s * jax.random.normal(keys[i], (3 * H,), jnp.float32); i += 1
    return p


def pack_params(p):
    """Repack PyTorch-layout GRU weights into direction+gate lane-packed slabs.

    Gate column layout everywhere: [r_f r_b z_f z_b n_f n_b], each block H wide.
    """
    def gate_w(w, g):                       # (3H, in) -> (in, H), transposed per-gate
        return w[g * H:(g + 1) * H, :].T

    def gate_b(b, g):                       # (3H,) -> (H,)
        return b[g * H:(g + 1) * H]

    # Layer-0 input slab (2E, 6H): rows [0:E] act on emb[t], rows [E:2E] on emb[S-1-t].
    wih0 = jnp.zeros((2 * E, H6), jnp.float32)
    for g in range(3):
        wih0 = wih0.at[0:E, g * H2:g * H2 + H].set(gate_w(p["w_ih_l0_d0"], g))
        wih0 = wih0.at[E:2 * E, g * H2 + H:(g + 1) * H2].set(gate_w(p["w_ih_l0_d1"], g))

    # Layer-1 input slab (4H, 6H):
    #   rows [0:2H]  act on out0_loop[t] = [fwd(t)     | bwd(S-1-t)]
    #   rows [2H:4H] act on out0_rev[t]  = [fwd(S-1-t) | bwd(t)    ]
    wih1 = jnp.zeros((4 * H, H6), jnp.float32)
    for g in range(3):
        wf = gate_w(p["w_ih_l1_d0"], g)     # (2H, H): rows 0:H act on fwd half, H:2H on bwd half
        wb = gate_w(p["w_ih_l1_d1"], g)
        wih1 = wih1.at[0:H, g * H2:g * H2 + H].set(wf[0:H])                       # fwd(t)      -> fwd gate
        wih1 = wih1.at[3 * H:4 * H, g * H2:g * H2 + H].set(wf[H:2 * H])           # bwd(t)      -> fwd gate
        wih1 = wih1.at[H:2 * H, g * H2 + H:(g + 1) * H2].set(wb[H:2 * H])         # bwd(S-1-t)  -> bwd gate
        wih1 = wih1.at[2 * H:3 * H, g * H2 + H:(g + 1) * H2].set(wb[0:H])         # fwd(S-1-t)  -> bwd gate

    # Hidden->hidden block-diagonal slabs (L, 2H, 6H).
    whh = jnp.zeros((L, H2, H6), jnp.float32)
    for l in range(L):
        for g in range(3):
            whh = whh.at[l, 0:H, g * H2:g * H2 + H].set(gate_w(p[f"w_hh_l{l}_d0"], g))
            whh = whh.at[l, H:2 * H, g * H2 + H:(g + 1) * H2].set(gate_w(p[f"w_hh_l{l}_d1"], g))

    # Bias slab (L, 8H): gate biases (b_ih [+ b_hh for r,z]) then [b_hn_f | b_hn_b].
    bias = jnp.zeros((L, H8), jnp.float32)
    for l in range(L):
        for g in range(3):
            bf = gate_b(p[f"b_ih_l{l}_d0"], g)
            bb = gate_b(p[f"b_ih_l{l}_d1"], g)
            if g < 2:   # fold hidden biases of r and z into the precomputed gi
                bf = bf + gate_b(p[f"b_hh_l{l}_d0"], g)
                bb = bb + gate_b(p[f"b_hh_l{l}_d1"], g)
            bias = bias.at[l, g * H2:g * H2 + H].set(bf)
            bias = bias.at[l, g * H2 + H:(g + 1) * H2].set(bb)
        bias = bias.at[l, H6:H6 + H].set(gate_b(p[f"b_hh_l{l}_d0"], 2))
        bias = bias.at[l, H6 + H:H8].set(gate_b(p[f"b_hh_l{l}_d1"], 2))

    return {"table": p["embedding"], "wih0": wih0, "wih1": wih1,
            "whh": whh, "bias": bias}


def rnn_en_forward(tokens, packed):
    """tokens: (S,) int32.  Returns (out (S,1,H), hidden (2L,1,H)) like PyTorch."""
    out2d, hidp = pl.pallas_call(
        encoder_kernel,
        out_shape=(jax.ShapeDtypeStruct((S, H), jnp.float32),
                   jax.ShapeDtypeStruct((L, H2), jnp.float32)),
        in_specs=[
            pl.BlockSpec(memory_space=pltpu.MemorySpace.VMEM),   # token ids (S,1) int32
            pl.BlockSpec(memory_space=pltpu.MemorySpace.VMEM),   # embedding table
            pl.BlockSpec(memory_space=pltpu.MemorySpace.VMEM),   # wih0 slab
            pl.BlockSpec(memory_space=pltpu.MemorySpace.VMEM),   # wih1 slab
            pl.BlockSpec(memory_space=pltpu.MemorySpace.VMEM),   # whh slab
            pl.BlockSpec(memory_space=pltpu.MemorySpace.VMEM),   # bias slab
        ],
        out_specs=(pl.BlockSpec(memory_space=pltpu.MemorySpace.VMEM),
                   pl.BlockSpec(memory_space=pltpu.MemorySpace.VMEM)),
        scratch_shapes=[pltpu.VMEM((S, H2), jnp.float32),        # layer-0 per-step hiddens
                        pltpu.VMEM((S, H2), jnp.float32)],       # layer-1 per-step hiddens
    )(tokens.reshape(S, 1).astype(jnp.int32), packed["table"], packed["wih0"],
      packed["wih1"], packed["whh"], packed["bias"])
    # (L, 2H) packed [fwd|bwd] per layer -> (2L, H) in PyTorch order [l0f, l0b, l1f, l1b].
    return out2d[:, None, :], hidp.reshape(2 * L, H)[:, None, :]


# -------------------------------------------------------------------------
# pure-JAX reference, written directly from the PyTorch (fused 3H) layout
# -------------------------------------------------------------------------
def rnn_en_reference(tokens, params):
    table = params["embedding"]
    emb = table[tokens]                                  # (S, E)
    norm = jnp.sqrt(jnp.sum(emb * emb, axis=1, keepdims=True))
    emb = jnp.where(norm > 1.0, emb / norm, emb)         # nn.Embedding(max_norm=1)

    def cell(x_t, h, w_ih, w_hh, b_ih, b_hh):
        gi = x_t @ w_ih.T + b_ih
        gh = h @ w_hh.T + b_hh
        r = jax.nn.sigmoid(gi[:, :H] + gh[:, :H])
        z = jax.nn.sigmoid(gi[:, H:2 * H] + gh[:, H:2 * H])
        n = jnp.tanh(gi[:, 2 * H:] + r * gh[:, 2 * H:])
        return (1.0 - z) * n + z * h

    x = emb
    finals = []
    for l in range(L):
        outs_dir = []
        for d in range(2):
            w_ih = params[f"w_ih_l{l}_d{d}"]; w_hh = params[f"w_hh_l{l}_d{d}"]
            b_ih = params[f"b_ih_l{l}_d{d}"]; b_hh = params[f"b_hh_l{l}_d{d}"]
            h = jnp.zeros((1, H), jnp.float32)
            outs = [None] * S
            steps = range(S - 1, -1, -1) if d == 1 else range(S)
            for t in steps:
                h = cell(x[t:t + 1], h, w_ih, w_hh, b_ih, b_hh)
                outs[t] = h
            outs_dir.append(jnp.concatenate(outs, 0))
            finals.append(h)
        x = jnp.concatenate(outs_dir, axis=1)            # (S, 2H) -> next layer
    out = x[:, :H] + x[:, H:]                            # (S, H)
    hidden = jnp.concatenate(finals, 0)                  # (2L, H)
    return out[:, None, :], hidden[:, None, :]


if __name__ == "__main__":
    key = jax.random.PRNGKey(0)
    kp, kt = jax.random.split(key)

    params = make_params(kp)
    packed = pack_params(params)
    tokens = jax.random.randint(kt, (S,), 0, V, dtype=jnp.int32)   # input sentence

    out, hidden = jax.jit(rnn_en_forward)(tokens, packed)
    out = jax.block_until_ready(out)
    hidden = jax.block_until_ready(hidden)

    ref_out, ref_hidden = rnn_en_reference(tokens, params)
    assert out.shape == (S, 1, H) and hidden.shape == (2 * L, 1, H)
    assert jnp.allclose(out, ref_out, atol=1e-3, rtol=1e-3)
    assert jnp.allclose(hidden, ref_hidden, atol=1e-3, rtol=1e-3)

    # TODO(synk): nn.Embedding(max_norm=1) also renormalizes the weight table
    # in place (a persistent side effect); only the forward-value renorm is modeled.
    print("KERNEL_OK")
</pallas_src>

<mosaic_0001>
module attributes {stable_mosaic.version = 11 : i64} {
  func.func @encoder_kernel(%arg0: memref<8x1xi32, #tpu.memory_space<vmem>>, %arg1: memref<16x16xf32, #tpu.memory_space<vmem>>, %arg2: memref<32x192xf32, #tpu.memory_space<vmem>>, %arg3: memref<128x192xf32, #tpu.memory_space<vmem>>, %arg4: memref<2x64x192xf32, #tpu.memory_space<vmem>>, %arg5: memref<2x256xf32, #tpu.memory_space<vmem>>, %arg6: memref<8x32xf32, #tpu.memory_space<vmem>>, %arg7: memref<2x64xf32, #tpu.memory_space<vmem>>, %arg8: memref<8x64xf32, #tpu.memory_space<vmem>>, %arg9: memref<8x64xf32, #tpu.memory_space<vmem>>) attributes {dimension_semantics = [], scalar_prefetch = 0 : i64, scratch_operands = 2 : i64, tpu.core_type = #tpu.core_type<tc>} {
    %c0 = arith.constant 0 : index
    %c0_0 = arith.constant 0 : index
    %0 = vector.load %arg0[%c0, %c0_0] : memref<8x1xi32, #tpu.memory_space<vmem>>, vector<8x1xi32>
    %1 = tpu.iota {dimensions = array<i32: 1>} : vector<8x16xi32>
    %2 = vector.broadcast %0 : vector<8x1xi32> to vector<8x16xi32>
    %3 = arith.cmpi eq, %1, %2 : vector<8x16xi32>
    %4 = arith.extui %3 : vector<8x16xi1> to vector<8x16xi32>
    %5 = arith.sitofp %4 : vector<8x16xi32> to vector<8x16xf32>
    %c0_1 = arith.constant 0 : index
    %c0_2 = arith.constant 0 : index
    %6 = vector.load %arg1[%c0_1, %c0_2] : memref<16x16xf32, #tpu.memory_space<vmem>>, vector<16x16xf32>
    %cst = arith.constant dense<0.000000e+00> : vector<8x16xf32>
    %7 = tpu.matmul %5, %6, %cst {dimension_numbers = #tpu.dot_dimension_numbers<[1], [0], [0], [1], [0, 0, 1, 1], [], []>} : vector<8x16xf32>, vector<16x16xf32>, vector<8x16xf32> -> vector<8x16xf32>
    %8 = arith.mulf %7, %7 : vector<8x16xf32>
    %cst_3 = arith.constant dense<0.000000e+00> : vector<8xf32>
    %9 = vector.multi_reduction <add>, %8, %cst_3 [1] : vector<8x16xf32> to vector<8xf32>
    %10 = vector.shape_cast %9 : vector<8xf32> to vector<8x1xf32>
    %cst_4 = arith.constant 1.000000e+00 : f32
    %11 = vector.broadcast %cst_4 : f32 to vector<8x1xf32>
    %12 = arith.cmpf ogt, %10, %11 : vector<8x1xf32>
    %13 = math.rsqrt %10 : vector<8x1xf32>
    %cst_5 = arith.constant 1.000000e+00 : f32
    %14 = vector.broadcast %cst_5 : f32 to vector<8x1xf32>
    %15 = arith.select %12, %13, %14 : vector<8x1xi1>, vector<8x1xf32>
    %16 = vector.broadcast %15 : vector<8x1xf32> to vector<8x16xf32>
    %17 = arith.mulf %7, %16 : vector<8x16xf32>
    %18 = tpu.iota {dimensions = array<i32: 0>} : vector<8x8xi32>
    %19 = tpu.iota {dimensions = array<i32: 1>} : vector<8x8xi32>
    %20 = arith.addi %18, %19 : vector<8x8xi32>
    %c7_i32 = arith.constant 7 : i32
    %21 = vector.broadcast %c7_i32 : i32 to vector<8x8xi32>
    %22 = arith.cmpi eq, %20, %21 : vector<8x8xi32>
    %23 = arith.extui %22 : vector<8x8xi1> to vector<8x8xi32>
    %24 = arith.sitofp %23 : vector<8x8xi32> to vector<8x8xf32>
    %cst_6 = arith.constant dense<0.000000e+00> : vector<8x16xf32>
    %25 = tpu.matmul %24, %17, %cst_6 {dimension_numbers = #tpu.dot_dimension_numbers<[1], [0], [0], [1], [0, 0, 1, 1], [], []>} : vector<8x8xf32>, vector<8x16xf32>, vector<8x16xf32> -> vector<8x16xf32>
    %c0_7 = arith.constant 0 : index
    %c0_8 = arith.constant 0 : index
    %26 = vector.load %arg2[%c0_7, %c0_8] : memref<32x192xf32, #tpu.memory_space<vmem>>, vector<16x192xf32>
    %cst_9 = arith.constant dense<0.000000e+00> : vector<8x192xf32>
    %27 = tpu.matmul %17, %26, %cst_9 {dimension_numbers = #tpu.dot_dimension_numbers<[1], [0], [0], [1], [0, 0, 1, 1], [], []>} : vector<8x16xf32>, vector<16x192xf32>, vector<8x192xf32> -> vector<8x192xf32>
    %c16 = arith.constant 16 : index
    %c0_10 = arith.constant 0 : index
    %28 = vector.load %arg2[%c16, %c0_10] : memref<32x192xf32, #tpu.memory_space<vmem>>, vector<16x192xf32>
    %cst_11 = arith.constant dense<0.000000e+00> : vector<8x192xf32>
    %29 = tpu.matmul %25, %28, %cst_11 {dimension_numbers = #tpu.dot_dimension_numbers<[1], [0], [0], [1], [0, 0, 1, 1], [], []>} : vector<8x16xf32>, vector<16x192xf32>, vector<8x192xf32> -> vector<8x192xf32>
    %30 = arith.addf %27, %29 : vector<8x192xf32>
    %c0_12 = arith.constant 0 : index
    %c0_13 = arith.constant 0 : index
    %31 = vector.load %arg5[%c0_12, %c0_13] : memref<2x256xf32, #tpu.memory_space<vmem>>, vector<1x192xf32>
    %32 = vector.broadcast %31 : vector<1x192xf32> to vector<8x192xf32>
    %33 = arith.addf %30, %32 : vector<8x192xf32>
    %c0_14 = arith.constant 0 : index
    %c0_15 = arith.constant 0 : index
    %c0_16 = arith.constant 0 : index
    %34 = vector.load %arg4[%c0_14, %c0_15, %c0_16] : memref<2x64x192xf32, #tpu.memory_space<vmem>>, vector<1x64x192xf32>
    %35 = vector.shape_cast %34 : vector<1x64x192xf32> to vector<64x192xf32>
    %c0_17 = arith.constant 0 : index
    %c192 = arith.constant 192 : index
    %36 = vector.load %arg5[%c0_17, %c192] : memref<2x256xf32, #tpu.memory_space<vmem>>, vector<1x64xf32>
    %cst_18 = arith.constant 0.000000e+00 : f32
    %37 = vector.broadcast %cst_18 : f32 to vector<1x64xf32>
    %cst_19 = arith.constant dense<0.000000e+00> : vector<1x192xf32>
    %38 = tpu.matmul %37, %35, %cst_19 {dimension_numbers = #tpu.dot_dimension_numbers<[1], [0], [0], [1], [0, 0, 1, 1], [], []>} : vector<1x64xf32>, vector<64x192xf32>, vector<1x192xf32> -> vector<1x192xf32>
    %39 = vector.extract_strided_slice %33 {offsets = [0, 0], sizes = [1, 192], strides = [1, 1]} : vector<8x192xf32> to vector<1x192xf32>
    %40 = vector.extract_strided_slice %39 {offsets = [0, 0], sizes = [1, 64], strides = [1, 1]} : vector<1x192xf32> to vector<1x64xf32>
    %41 = vector.extract_strided_slice %38 {offsets = [0, 0], sizes = [1, 64], strides = [1, 1]} : vector<1x192xf32> to vector<1x64xf32>
    %42 = arith.addf %40, %41 : vector<1x64xf32>
    %43 = arith.negf %42 : vector<1x64xf32>
    %44 = math.exp %43 : vector<1x64xf32>
    %cst_20 = arith.constant 1.000000e+00 : f32
    %45 = vector.broadcast %cst_20 : f32 to vector<1x64xf32>
    %46 = arith.addf %45, %44 : vector<1x64xf32>
    %47 = arith.divf %45, %46 : vector<1x64xf32>
    %48 = vector.extract_strided_slice %39 {offsets = [0, 64], sizes = [1, 64], strides = [1, 1]} : vector<1x192xf32> to vector<1x64xf32>
    %49 = vector.extract_strided_slice %38 {offsets = [0, 64], sizes = [1, 64], strides = [1, 1]} : vector<1x192xf32> to vector<1x64xf32>
    %50 = arith.addf %48, %49 : vector<1x64xf32>
    %51 = arith.negf %50 : vector<1x64xf32>
    %52 = math.exp %51 : vector<1x64xf32>
    %cst_21 = arith.constant 1.000000e+00 : f32
    %53 = vector.broadcast %cst_21 : f32 to vector<1x64xf32>
    %54 = arith.addf %53, %52 : vector<1x64xf32>
    %55 = arith.divf %53, %54 : vector<1x64xf32>
    %56 = vector.extract_strided_slice %39 {offsets = [0, 128], sizes = [1, 64], strides = [1, 1]} : vector<1x192xf32> to vector<1x64xf32>
    %57 = vector.extract_strided_slice %38 {offsets = [0, 128], sizes = [1, 64], strides = [1, 1]} : vector<1x192xf32> to vector<1x64xf32>
    %58 = arith.addf %57, %36 : vector<1x64xf32>
    %59 = arith.mulf %47, %58 : vector<1x64xf32>
    %60 = arith.addf %56, %59 : vector<1x64xf32>
    %61 = math.tanh %60 : vector<1x64xf32>
    %cst_22 = arith.constant 1.000000e+00 : f32
    %62 = vector.broadcast %cst_22 : f32 to vector<1x64xf32>
    %63 = arith.subf %62, %55 : vector<1x64xf32>
    %64 = arith.mulf %63, %61 : vector<1x64xf32>
    %65 = arith.mulf %55, %37 : vector<1x64xf32>
    %66 = arith.addf %64, %65 : vector<1x64xf32>
    %c0_23 = arith.constant 0 : index
    %c0_24 = arith.constant 0 : index
    %67 = vector.load %arg8[%c0_23, %c0_24] : memref<8x64xf32, #tpu.memory_space<vmem>>, vector<1x64xf32>
    tpu.vector_store %arg8[%c0_23, %c0_24], %66 {strides = array<i32>} : memref<8x64xf32, #tpu.memory_space<vmem>>, vector<1x64xf32>,
    %cst_25 = arith.constant dense<0.000000e+00> : vector<1x192xf32>
    %68 = tpu.matmul %66, %35, %cst_25 {dimension_numbers = #tpu.dot_dimension_numbers<[1], [0], [0], [1], [0, 0, 1, 1], [], []>} : vector<1x64xf32>, vector<64x192xf32>, vector<1x192xf32> -> vector<1x192xf32>
    %69 = vector.extract_strided_slice %33 {offsets = [1, 0], sizes = [1, 192], strides = [1, 1]} : vector<8x192xf32> to vector<1x192xf32>
    %70 = vector.extract_strided_slice %69 {offsets = [0, 0], sizes = [1, 64], strides = [1, 1]} : vector<1x192xf32> to vector<1x64xf32>
    %71 = vector.extract_strided_slice %68 {offsets = [0, 0], sizes = [1, 64], strides = [1, 1]} : vector<1x192xf32> to vector<1x64xf32>
    %72 = arith.addf %70, %71 : vector<1x64xf32>
    %73 = arith.negf %72 : vector<1x64xf32>
    %74 = math.exp %73 : vector<1x64xf32>
    %cst_26 = arith.constant 1.000000e+00 : f32
    %75 = vector.broadcast %cst_26 : f32 to vector<1x64xf32>
    %76 = arith.addf %75, %74 : vector<1x64xf32>
    %77 = arith.divf %75, %76 : vector<1x64xf32>
    %78 = vector.extract_strided_slice %69 {offsets = [0, 64], sizes = [1, 64], strides = [1, 1]} : vector<1x192xf32> to vector<1x64xf32>
    %79 = vector.extract_strided_slice %68 {offsets = [0, 64], sizes = [1, 64], strides = [1, 1]} : vector<1x192xf32> to vector<1x64xf32>
    %80 = arith.addf %78, %79 : vector<1x64xf32>
    %81 = arith.negf %80 : vector<1x64xf32>
    %82 = math.exp %81 : vector<1x64xf32>
    %cst_27 = arith.constant 1.000000e+00 : f32
    %83 = vector.broadcast %cst_27 : f32 to vector<1x64xf32>
    %84 = arith.addf %83, %82 : vector<1x64xf32>
    %85 = arith.divf %83, %84 : vector<1x64xf32>
    %86 = vector.extract_strided_slice %69 {offsets = [0, 128], sizes = [1, 64], strides = [1, 1]} : vector<1x192xf32> to vector<1x64xf32>
    %87 = vector.extract_strided_slice %68 {offsets = [0, 128], sizes = [1, 64], strides = [1, 1]} : vector<1x192xf32> to vector<1x64xf32>
    %88 = arith.addf %87, %36 : vector<1x64xf32>
    %89 = arith.mulf %77, %88 : vector<1x64xf32>
    %90 = arith.addf %86, %89 : vector<1x64xf32>
    %91 = math.tanh %90 : vector<1x64xf32>
    %cst_28 = arith.constant 1.000000e+00 : f32
    %92 = vector.broadcast %cst_28 : f32 to vector<1x64xf32>
    %93 = arith.subf %92, %85 : vector<1x64xf32>
    %94 = arith.mulf %93, %91 : vector<1x64xf32>
    %95 = arith.mulf %85, %66 : vector<1x64xf32>
    %96 = arith.addf %94, %95 : vector<1x64xf32>
    %c1 = arith.constant 1 : index
    %c0_29 = arith.constant 0 : index
    %97 = vector.load %arg8[%c1, %c0_29] : memref<8x64xf32, #tpu.memory_space<vmem>>, vector<1x64xf32>
    tpu.vector_store %arg8[%c1, %c0_29], %96 {strides = array<i32>} : memref<8x64xf32, #tpu.memory_space<vmem>>, vector<1x64xf32>,
    %cst_30 = arith.constant dense<0.000000e+00> : vector<1x192xf32>
    %98 = tpu.matmul %96, %35, %cst_30 {dimension_numbers = #tpu.dot_dimension_numbers<[1], [0], [0], [1], [0, 0, 1, 1], [], []>} : vector<1x64xf32>, vector<64x192xf32>, vector<1x192xf32> -> vector<1x192xf32>
    %99 = vector.extract_strided_slice %33 {offsets = [2, 0], sizes = [1, 192], strides = [1, 1]} : vector<8x192xf32> to vector<1x192xf32>
    %100 = vector.extract_strided_slice %99 {offsets = [0, 0], sizes = [1, 64], strides = [1, 1]} : vector<1x192xf32> to vector<1x64xf32>
    %101 = vector.extract_strided_slice %98 {offsets = [0, 0], sizes = [1, 64], strides = [1, 1]} : vector<1x192xf32> to vector<1x64xf32>
    %102 = arith.addf %100, %101 : vector<1x64xf32>
    %103 = arith.negf %102 : vector<1x64xf32>
    %104 = math.exp %103 : vector<1x64xf32>
    %cst_31 = arith.constant 1.000000e+00 : f32
    %105 = vector.broadcast %cst_31 : f32 to vector<1x64xf32>
    %106 = arith.addf %105, %104 : vector<1x64xf32>
    %107 = arith.divf %105, %106 : vector<1x64xf32>
    %108 = vector.extract_strided_slice %99 {offsets = [0, 64], sizes = [1, 64], strides = [1, 1]} : vector<1x192xf32> to vector<1x64xf32>
    %109 = vector.extract_strided_slice %98 {offsets = [0, 64], sizes = [1, 64], strides = [1, 1]} : vector<1x192xf32> to vector<1x64xf32>
    %110 = arith.addf %108, %109 : vector<1x64xf32>
    %111 = arith.negf %110 : vector<1x64xf32>
    %112 = math.exp %111 : vector<1x64xf32>
    %cst_32 = arith.constant 1.000000e+00 : f32
    %113 = vector.broadcast %cst_32 : f32 to vector<1x64xf32>
    %114 = arith.addf %113, %112 : vector<1x64xf32>
    %115 = arith.divf %113, %114 : vector<1x64xf32>
    %116 = vector.extract_strided_slice %99 {offsets = [0, 128], sizes = [1, 64], strides = [1, 1]} : vector<1x192xf32> to vector<1x64xf32>
    %117 = vector.extract_strided_slice %98 {offsets = [0, 128], sizes = [1, 64], strides = [1, 1]} : vector<1x192xf32> to vector<1x64xf32>
    %118 = arith.addf %117, %36 : vector<1x64xf32>
    %119 = arith.mulf %107, %118 : vector<1x64xf32>
    %120 = arith.addf %116, %119 : vector<1x64xf32>
    %121 = math.tanh %120 : vector<1x64xf32>
    %cst_33 = arith.constant 1.000000e+00 : f32
    %122 = vector.broadcast %cst_33 : f32 to vector<1x64xf32>
    %123 = arith.subf %122, %115 : vector<1x64xf32>
    %124 = arith.mulf %123, %121 : vector<1x64xf32>
    %125 = arith.mulf %115, %96 : vector<1x64xf32>
    %126 = arith.addf %124, %125 : vector<1x64xf32>
    %c2 = arith.constant 2 : index
    %c0_34 = arith.constant 0 : index
    %127 = vector.load %arg8[%c2, %c0_34] : memref<8x64xf32, #tpu.memory_space<vmem>>, vector<1x64xf32>
    tpu.vector_store %arg8[%c2, %c0_34], %126 {strides = array<i32>} : memref<8x64xf32, #tpu.memory_space<vmem>>, vector<1x64xf32>,
    %cst_35 = arith.constant dense<0.000000e+00> : vector<1x192xf32>
    %128 = tpu.matmul %126, %35, %cst_35 {dimension_numbers = #tpu.dot_dimension_numbers<[1], [0], [0], [1], [0, 0, 1, 1], [], []>} : vector<1x64xf32>, vector<64x192xf32>, vector<1x192xf32> -> vector<1x192xf32>
    %129 = vector.extract_strided_slice %33 {offsets = [3, 0], sizes = [1, 192], strides = [1, 1]} : vector<8x192xf32> to vector<1x192xf32>
    %130 = vector.extract_strided_slice %129 {offsets = [0, 0], sizes = [1, 64], strides = [1, 1]} : vector<1x192xf32> to vector<1x64xf32>
    %131 = vector.extract_strided_slice %128 {offsets = [0, 0], sizes = [1, 64], strides = [1, 1]} : vector<1x192xf32> to vector<1x64xf32>
    %132 = arith.addf %130, %131 : vector<1x64xf32>
    %133 = arith.negf %132 : vector<1x64xf32>
    %134 = math.exp %133 : vector<1x64xf32>
    %cst_36 = arith.constant 1.000000e+00 : f32
    %135 = vector.broadcast %cst_36 : f32 to vector<1x64xf32>
    %136 = arith.addf %135, %134 : vector<1x64xf32>
    %137 = arith.divf %135, %136 : vector<1x64xf32>
    %138 = vector.extract_strided_slice %129 {offsets = [0, 64], sizes = [1, 64], strides = [1, 1]} : vector<1x192xf32> to vector<1x64xf32>
    %139 = vector.extract_strided_slice %128 {offsets = [0, 64], sizes = [1, 64], strides = [1, 1]} : vector<1x192xf32> to vector<1x64xf32>
    %140 = arith.addf %138, %139 : vector<1x64xf32>
    %141 = arith.negf %140 : vector<1x64xf32>
    %142 = math.exp %141 : vector<1x64xf32>
    %cst_37 = arith.constant 1.000000e+00 : f32
    %143 = vector.broadcast %cst_37 : f32 to vector<1x64xf32>
    %144 = arith.addf %143, %142 : vector<1x64xf32>
    %145 = arith.divf %143, %144 : vector<1x64xf32>
    %146 = vector.extract_strided_slice %129 {offsets = [0, 128], sizes = [1, 64], strides = [1, 1]} : vector<1x192xf32> to vector<1x64xf32>
    %147 = vector.extract_strided_slice %128 {offsets = [0, 128], sizes = [1, 64], strides = [1, 1]} : vector<1x192xf32> to vector<1x64xf32>
    %148 = arith.addf %147, %36 : vector<1x64xf32>
    %149 = arith.mulf %137, %148 : vector<1x64xf32>
    %150 = arith.addf %146, %149 : vector<1x64xf32>
    %151 = math.tanh %150 : vector<1x64xf32>
    %cst_38 = arith.constant 1.000000e+00 : f32
    %152 = vector.broadcast %cst_38 : f32 to vector<1x64xf32>
    %153 = arith.subf %152, %145 : vector<1x64xf32>
    %154 = arith.mulf %153, %151 : vector<1x64xf32>
    %155 = arith.mulf %145, %126 : vector<1x64xf32>
    %156 = arith.addf %154, %155 : vector<1x64xf32>
    %c3 = arith.constant 3 : index
    %c0_39 = arith.constant 0 : index
    %157 = vector.load %arg8[%c3, %c0_39] : memref<8x64xf32, #tpu.memory_space<vmem>>, vector<1x64xf32>
    tpu.vector_store %arg8[%c3, %c0_39], %156 {strides = array<i32>} : memref<8x64xf32, #tpu.memory_space<vmem>>, vector<1x64xf32>,
    %cst_40 = arith.constant dense<0.000000e+00> : vector<1x192xf32>
    %158 = tpu.matmul %156, %35, %cst_40 {dimension_numbers = #tpu.dot_dimension_numbers<[1], [0], [0], [1], [0, 0, 1, 1], [], []>} : vector<1x64xf32>, vector<64x192xf32>, vector<1x192xf32> -> vector<1x192xf32>
    %159 = vector.extract_strided_slice %33 {offsets = [4, 0], sizes = [1, 192], strides = [1, 1]} : vector<8x192xf32> to vector<1x192xf32>
    %160 = vector.extract_strided_slice %159 {offsets = [0, 0], sizes = [1, 64], strides = [1, 1]} : vector<1x192xf32> to vector<1x64xf32>
    %161 = vector.extract_strided_slice %158 {offsets = [0, 0], sizes = [1, 64], strides = [1, 1]} : vector<1x192xf32> to vector<1x64xf32>
    %162 = arith.addf %160, %161 : vector<1x64xf32>
    %163 = arith.negf %162 : vector<1x64xf32>
    %164 = math.exp %163 : vector<1x64xf32>
    %cst_41 = arith.constant 1.000000e+00 : f32
    %165 = vector.broadcast %cst_41 : f32 to vector<1x64xf32>
    %166 = arith.addf %165, %164 : vector<1x64xf32>
    %167 = arith.divf %165, %166 : vector<1x64xf32>
    %168 = vector.extract_strided_slice %159 {offsets = [0, 64], sizes = [1, 64], strides = [1, 1]} : vector<1x192xf32> to vector<1x64xf32>
    %169 = vector.extract_strided_slice %158 {offsets = [0, 64], sizes = [1, 64], strides = [1, 1]} : vector<1x192xf32> to vector<1x64xf32>
    %170 = arith.addf %168, %169 : vector<1x64xf32>
    %171 = arith.negf %170 : vector<1x64xf32>
    %172 = math.exp %171 : vector<1x64xf32>
    %cst_42 = arith.constant 1.000000e+00 : f32
    %173 = vector.broadcast %cst_42 : f32 to vector<1x64xf32>
    %174 = arith.addf %173, %172 : vector<1x64xf32>
    %175 = arith.divf %173, %174 : vector<1x64xf32>
    %176 = vector.extract_strided_slice %159 {offsets = [0, 128], sizes = [1, 64], strides = [1, 1]} : vector<1x192xf32> to vector<1x64xf32>
    %177 = vector.extract_strided_slice %158 {offsets = [0, 128], sizes = [1, 64], strides = [1, 1]} : vector<1x192xf32> to vector<1x64xf32>
    %178 = arith.addf %177, %36 : vector<1x64xf32>
    %179 = arith.mulf %167, %178 : vector<1x64xf32>
    %180 = arith.addf %176, %179 : vector<1x64xf32>
    %181 = math.tanh %180 : vector<1x64xf32>
    %cst_43 = arith.constant 1.000000e+00 : f32
    %182 = vector.broadcast %cst_43 : f32 to vector<1x64xf32>
    %183 = arith.subf %182, %175 : vector<1x64xf32>
    %184 = arith.mulf %183, %181 : vector<1x64xf32>
    %185 = arith.mulf %175, %156 : vector<1x64xf32>
    %186 = arith.addf %184, %185 : vector<1x64xf32>
    %c4 = arith.constant 4 : index
    %c0_44 = arith.constant 0 : index
    %187 = vector.load %arg8[%c4, %c0_44] : memref<8x64xf32, #tpu.memory_space<vmem>>, vector<1x64xf32>
    tpu.vector_store %arg8[%c4, %c0_44], %186 {strides = array<i32>} : memref<8x64xf32, #tpu.memory_space<vmem>>, vector<1x64xf32>,
    %cst_45 = arith.constant dense<0.000000e+00> : vector<1x192xf32>
    %188 = tpu.matmul %186, %35, %cst_45 {dimension_numbers = #tpu.dot_dimension_numbers<[1], [0], [0], [1], [0, 0, 1, 1], [], []>} : vector<1x64xf32>, vector<64x192xf32>, vector<1x192xf32> -> vector<1x192xf32>
    %189 = vector.extract_strided_slice %33 {offsets = [5, 0], sizes = [1, 192], strides = [1, 1]} : vector<8x192xf32> to vector<1x192xf32>
    %190 = vector.extract_strided_slice %189 {offsets = [0, 0], sizes = [1, 64], strides = [1, 1]} : vector<1x192xf32> to vector<1x64xf32>
    %191 = vector.extract_strided_slice %188 {offsets = [0, 0], sizes = [1, 64], strides = [1, 1]} : vector<1x192xf32> to vector<1x64xf32>
    %192 = arith.addf %190, %191 : vector<1x64xf32>
    %193 = arith.negf %192 : vector<1x64xf32>
    %194 = math.exp %193 : vector<1x64xf32>
    %cst_46 = arith.constant 1.000000e+00 : f32
    %195 = vector.broadcast %cst_46 : f32 to vector<1x64xf32>
    %196 = arith.addf %195, %194 : vector<1x64xf32>
    %197 = arith.divf %195, %196 : vector<1x64xf32>
    %198 = vector.extract_strided_slice %189 {offsets = [0, 64], sizes = [1, 64], strides = [1, 1]} : vector<1x192xf32> to vector<1x64xf32>
    %199 = vector.extract_strided_slice %188 {offsets = [0, 64], sizes = [1, 64], strides = [1, 1]} : vector<1x192xf32> to vector<1x64xf32>
    %200 = arith.addf %198, %199 : vector<1x64xf32>
    %201 = arith.negf %200 : vector<1x64xf32>
    %202 = math.exp %201 : vector<1x64xf32>
    %cst_47 = arith.constant 1.000000e+00 : f32
    %203 = vector.broadcast %cst_47 : f32 to vector<1x64xf32>
    %204 = arith.addf %203, %202 : vector<1x64xf32>
    %205 = arith.divf %203, %204 : vector<1x64xf32>
    %206 = vector.extract_strided_slice %189 {offsets = [0, 128], sizes = [1, 64], strides = [1, 1]} : vector<1x192xf32> to vector<1x64xf32>
    %207 = vector.extract_strided_slice %188 {offsets = [0, 128], sizes = [1, 64], strides = [1, 1]} : vector<1x192xf32> to vector<1x64xf32>
    %208 = arith.addf %207, %36 : vector<1x64xf32>
    %209 = arith.mulf %197, %208 : vector<1x64xf32>
    %210 = arith.addf %206, %209 : vector<1x64xf32>
    %211 = math.tanh %210 : vector<1x64xf32>
    %cst_48 = arith.constant 1.000000e+00 : f32
    %212 = vector.broadcast %cst_48 : f32 to vector<1x64xf32>
    %213 = arith.subf %212, %205 : vector<1x64xf32>
    %214 = arith.mulf %213, %211 : vector<1x64xf32>
    %215 = arith.mulf %205, %186 : vector<1x64xf32>
    %216 = arith.addf %214, %215 : vector<1x64xf32>
    %c5 = arith.constant 5 : index
    %c0_49 = arith.constant 0 : index
    %217 = vector.load %arg8[%c5, %c0_49] : memref<8x64xf32, #tpu.memory_space<vmem>>, vector<1x64xf32>
    tpu.vector_store %arg8[%c5, %c0_49], %216 {strides = array<i32>} : memref<8x64xf32, #tpu.memory_space<vmem>>, vector<1x64xf32>,
    %cst_50 = arith.constant dense<0.000000e+00> : vector<1x192xf32>
    %218 = tpu.matmul %216, %35, %cst_50 {dimension_numbers = #tpu.dot_dimension_numbers<[1], [0], [0], [1], [0, 0, 1, 1], [], []>} : vector<1x64xf32>, vector<64x192xf32>, vector<1x192xf32> -> vector<1x192xf32>
    %219 = vector.extract_strided_slice %33 {offsets = [6, 0], sizes = [1, 192], strides = [1, 1]} : vector<8x192xf32> to vector<1x192xf32>
    %220 = vector.extract_strided_slice %219 {offsets = [0, 0], sizes = [1, 64], strides = [1, 1]} : vector<1x192xf32> to vector<1x64xf32>
    %221 = vector.extract_strided_slice %218 {offsets = [0, 0], sizes = [1, 64], strides = [1, 1]} : vector<1x192xf32> to vector<1x64xf32>
    %222 = arith.addf %220, %221 : vector<1x64xf32>
    %223 = arith.negf %222 : vector<1x64xf32>
    %224 = math.exp %223 : vector<1x64xf32>
    %cst_51 = arith.constant 1.000000e+00 : f32
    %225 = vector.broadcast %cst_51 : f32 to vector<1x64xf32>
    %226 = arith.addf %225, %224 : vector<1x64xf32>
    %227 = arith.divf %225, %226 : vector<1x64xf32>
    %228 = vector.extract_strided_slice %219 {offsets = [0, 64], sizes = [1, 64], strides = [1, 1]} : vector<1x192xf32> to vector<1x64xf32>
    %229 = vector.extract_strided_slice %218 {offsets = [0, 64], sizes = [1, 64], strides = [1, 1]} : vector<1x192xf32> to vector<1x64xf32>
    %230 = arith.addf %228, %229 : vector<1x64xf32>
    %231 = arith.negf %230 : vector<1x64xf32>
    %232 = math.exp %231 : vector<1x64xf32>
    %cst_52 = arith.constant 1.000000e+00 : f32
    %233 = vector.broadcast %cst_52 : f32 to vector<1x64xf32>
    %234 = arith.addf %233, %232 : vector<1x64xf32>
    %235 = arith.divf %233, %234 : vector<1x64xf32>
    %236 = vector.extract_strided_slice %219 {offsets = [0, 128], sizes = [1, 64], strides = [1, 1]} : vector<1x192xf32> to vector<1x64xf32>
    %237 = vector.extract_strided_slice %218 {offsets = [0, 128], sizes = [1, 64], strides = [1, 1]} : vector<1x192xf32> to vector<1x64xf32>
    %238 = arith.addf %237, %36 : vector<1x64xf32>
    %239 = arith.mulf %227, %238 : vector<1x64xf32>
    %240 = arith.addf %236, %239 : vector<1x64xf32>
    %241 = math.tanh %240 : vector<1x64xf32>
    %cst_53 = arith.constant 1.000000e+00 : f32
    %242 = vector.broadcast %cst_53 : f32 to vector<1x64xf32>
    %243 = arith.subf %242, %235 : vector<1x64xf32>
    %244 = arith.mulf %243, %241 : vector<1x64xf32>
    %245 = arith.mulf %235, %216 : vector<1x64xf32>
    %246 = arith.addf %244, %245 : vector<1x64xf32>
    %c6 = arith.constant 6 : index
    %c0_54 = arith.constant 0 : index
    %247 = vector.load %arg8[%c6, %c0_54] : memref<8x64xf32, #tpu.memory_space<vmem>>, vector<1x64xf32>
    tpu.vector_store %arg8[%c6, %c0_54], %246 {strides = array<i32>} : memref<8x64xf32, #tpu.memory_space<vmem>>, vector<1x64xf32>,
    %cst_55 = arith.constant dense<0.000000e+00> : vector<1x192xf32>
    %248 = tpu.matmul %246, %35, %cst_55 {dimension_numbers = #tpu.dot_dimension_numbers<[1], [0], [0], [1], [0, 0, 1, 1], [], []>} : vector<1x64xf32>, vector<64x192xf32>, vector<1x192xf32> -> vector<1x192xf32>
    %249 = vector.extract_strided_slice %33 {offsets = [7, 0], sizes = [1, 192], strides = [1, 1]} : vector<8x192xf32> to vector<1x192xf32>
    %250 = vector.extract_strided_slice %249 {offsets = [0, 0], sizes = [1, 64], strides = [1, 1]} : vector<1x192xf32> to vector<1x64xf32>
    %251 = vector.extract_strided_slice %248 {offsets = [0, 0], sizes = [1, 64], strides = [1, 1]} : vector<1x192xf32> to vector<1x64xf32>
    %252 = arith.addf %250, %251 : vector<1x64xf32>
    %253 = arith.negf %252 : vector<1x64xf32>
    %254 = math.exp %253 : vector<1x64xf32>
    %cst_56 = arith.constant 1.000000e+00 : f32
    %255 = vector.broadcast %cst_56 : f32 to vector<1x64xf32>
    %256 = arith.addf %255, %254 : vector<1x64xf32>
    %257 = arith.divf %255, %256 : vector<1x64xf32>
    %258 = vector.extract_strided_slice %249 {offsets = [0, 64], sizes = [1, 64], strides = [1, 1]} : vector<1x192xf32> to vector<1x64xf32>
    %259 = vector.extract_strided_slice %248 {offsets = [0, 64], sizes = [1, 64], strides = [1, 1]} : vector<1x192xf32> to vector<1x64xf32>
    %260 = arith.addf %258, %259 : vector<1x64xf32>
    %261 = arith.negf %260 : vector<1x64xf32>
    %262 = math.exp %261 : vector<1x64xf32>
    %cst_57 = arith.constant 1.000000e+00 : f32
    %263 = vector.broadcast %cst_57 : f32 to vector<1x64xf32>
    %264 = arith.addf %263, %262 : vector<1x64xf32>
    %265 = arith.divf %263, %264 : vector<1x64xf32>
    %266 = vector.extract_strided_slice %249 {offsets = [0, 128], sizes = [1, 64], strides = [1, 1]} : vector<1x192xf32> to vector<1x64xf32>
    %267 = vector.extract_strided_slice %248 {offsets = [0, 128], sizes = [1, 64], strides = [1, 1]} : vector<1x192xf32> to vector<1x64xf32>
    %268 = arith.addf %267, %36 : vector<1x64xf32>
    %269 = arith.mulf %257, %268 : vector<1x64xf32>
    %270 = arith.addf %266, %269 : vector<1x64xf32>
    %271 = math.tanh %270 : vector<1x64xf32>
    %cst_58 = arith.constant 1.000000e+00 : f32
    %272 = vector.broadcast %cst_58 : f32 to vector<1x64xf32>
    %273 = arith.subf %272, %265 : vector<1x64xf32>
    %274 = arith.mulf %273, %271 : vector<1x64xf32>
    %275 = arith.mulf %265, %246 : vector<1x64xf32>
    %276 = arith.addf %274, %275 : vector<1x64xf32>
    %c7 = arith.constant 7 : index
    %c0_59 = arith.constant 0 : index
    %277 = vector.load %arg8[%c7, %c0_59] : memref<8x64xf32, #tpu.memory_space<vmem>>, vector<1x64xf32>
    tpu.vector_store %arg8[%c7, %c0_59], %276 {strides = array<i32>} : memref<8x64xf32, #tpu.memory_space<vmem>>, vector<1x64xf32>,
    %c0_60 = arith.constant 0 : index
    %c0_61 = arith.constant 0 : index
    %278 = vector.load %arg8[%c0_60, %c0_61] : memref<8x64xf32, #tpu.memory_space<vmem>>, vector<8x64xf32>
    %cst_62 = arith.constant dense<0.000000e+00> : vector<8x64xf32>
    %279 = tpu.matmul %24, %278, %cst_62 {dimension_numbers = #tpu.dot_dimension_numbers<[1], [0], [0], [1], [0, 0, 1, 1], [], []>} : vector<8x8xf32>, vector<8x64xf32>, vector<8x64xf32> -> vector<8x64xf32>
    %c0_63 = arith.constant 0 : index
    %c0_64 = arith.constant 0 : index
    %280 = vector.load %arg3[%c0_63, %c0_64] : memref<128x192xf32, #tpu.memory_space<vmem>>, vector<64x192xf32>
    %cst_65 = arith.constant dense<0.000000e+00> : vector<8x192xf32>
    %281 = tpu.matmul %278, %280, %cst_65 {dimension_numbers = #tpu.dot_dimension_numbers<[1], [0], [0], [1], [0, 0, 1, 1], [], []>} : vector<8x64xf32>, vector<64x192xf32>, vector<8x192xf32> -> vector<8x192xf32>
    %c64 = arith.constant 64 : index
    %c0_66 = arith.constant 0 : index
    %282 = vector.load %arg3[%c64, %c0_66] : memref<128x192xf32, #tpu.memory_space<vmem>>, vector<64x192xf32>
    %cst_67 = arith.constant dense<0.000000e+00> : vector<8x192xf32>
    %283 = tpu.matmul %279, %282, %cst_67 {dimension_numbers = #tpu.dot_dimension_numbers<[1], [0], [0], [1], [0, 0, 1, 1], [], []>} : vector<8x64xf32>, vector<64x192xf32>, vector<8x192xf32> -> vector<8x192xf32>
    %284 = arith.addf %281, %283 : vector<8x192xf32>
    %c1_68 = arith.constant 1 : index
    %c0_69 = arith.constant 0 : index
    %285 = vector.load %arg5[%c1_68, %c0_69] : memref<2x256xf32, #tpu.memory_space<vmem>>, vector<1x192xf32>
    %286 = vector.broadcast %285 : vector<1x192xf32> to vector<8x192xf32>
    %287 = arith.addf %284, %286 : vector<8x192xf32>
    %c1_70 = arith.constant 1 : index
    %c0_71 = arith.constant 0 : index
    %c0_72 = arith.constant 0 : index
    %288 = vector.load %arg4[%c1_70, %c0_71, %c0_72] : memref<2x64x192xf32, #tpu.memory_space<vmem>>, vector<1x64x192xf32>
    %289 = vector.shape_cast %288 : vector<1x64x192xf32> to vector<64x192xf32>
    %c1_73 = arith.constant 1 : index
    %c192_74 = arith.constant 192 : index
    %290 = vector.load %arg5[%c1_73, %c192_74] : memref<2x256xf32, #tpu.memory_space<vmem>>, vector<1x64xf32>
    %cst_75 = arith.constant 0.000000e+00 : f32
    %291 = vector.broadcast %cst_75 : f32 to vector<1x64xf32>
    %cst_76 = arith.constant dense<0.000000e+00> : vector<1x192xf32>
    %292 = tpu.matmul %291, %289, %cst_76 {dimension_numbers = #tpu.dot_dimension_numbers<[1], [0], [0], [1], [0, 0, 1, 1], [], []>} : vector<1x64xf32>, vector<64x192xf32>, vector<1x192xf32> -> vector<1x192xf32>
    %293 = vector.extract_strided_slice %287 {offsets = [0, 0], sizes = [1, 192], strides = [1, 1]} : vector<8x192xf32> to vector<1x192xf32>
    %294 = vector.extract_strided_slice %293 {offsets = [0, 0], sizes = [1, 64], strides = [1, 1]} : vector<1x192xf32> to vector<1x64xf32>
    %295 = vector.extract_strided_slice %292 {offsets = [0, 0], sizes = [1, 64], strides = [1, 1]} : vector<1x192xf32> to vector<1x64xf32>
    %296 = arith.addf %294, %295 : vector<1x64xf32>
    %297 = arith.negf %296 : vector<1x64xf32>
    %298 = math.exp %297 : vector<1x64xf32>
    %cst_77 = arith.constant 1.000000e+00 : f32
    %299 = vector.broadcast %cst_77 : f32 to vector<1x64xf32>
    %300 = arith.addf %299, %298 : vector<1x64xf32>
    %301 = arith.divf %299, %300 : vector<1x64xf32>
    %302 = vector.extract_strided_slice %293 {offsets = [0, 64], sizes = [1, 64], strides = [1, 1]} : vector<1x192xf32> to vector<1x64xf32>
    %303 = vector.extract_strided_slice %292 {offsets = [0, 64], sizes = [1, 64], strides = [1, 1]} : vector<1x192xf32> to vector<1x64xf32>
    %304 = arith.addf %302, %303 : vector<1x64xf32>
    %305 = arith.negf %304 : vector<1x64xf32>
    %306 = math.exp %305 : vector<1x64xf32>
    %cst_78 = arith.constant 1.000000e+00 : f32
    %307 = vector.broadcast %cst_78 : f32 to vector<1x64xf32>
    %308 = arith.addf %307, %306 : vector<1x64xf32>
    %309 = arith.divf %307, %308 : vector<1x64xf32>
    %310 = vector.extract_strided_slice %293 {offsets = [0, 128], sizes = [1, 64], strides = [1, 1]} : vector<1x192xf32> to vector<1x64xf32>
    %311 = vector.extract_strided_slice %292 {offsets = [0, 128], sizes = [1, 64], strides = [1, 1]} : vector<1x192xf32> to vector<1x64xf32>
    %312 = arith.addf %311, %290 : vector<1x64xf32>
    %313 = arith.mulf %301, %312 : vector<1x64xf32>
    %314 = arith.addf %310, %313 : vector<1x64xf32>
    %315 = math.tanh %314 : vector<1x64xf32>
    %cst_79 = arith.constant 1.000000e+00 : f32
    %316 = vector.broadcast %cst_79 : f32 to vector<1x64xf32>
    %317 = arith.subf %316, %309 : vector<1x64xf32>
    %318 = arith.mulf %317, %315 : vector<1x64xf32>
    %319 = arith.mulf %309, %291 : vector<1x64xf32>
    %320 = arith.addf %318, %319 : vector<1x64xf32>
    %c0_80 = arith.constant 0 : index
    %c0_81 = arith.constant 0 : index
    %321 = vector.load %arg9[%c0_80, %c0_81] : memref<8x64xf32, #tpu.memory_space<vmem>>, vector<1x64xf32>
    tpu.vector_store %arg9[%c0_80, %c0_81], %320 {strides = array<i32>} : memref<8x64xf32, #tpu.memory_space<vmem>>, vector<1x64xf32>,
    %cst_82 = arith.constant dense<0.000000e+00> : vector<1x192xf32>
    %322 = tpu.matmul %320, %289, %cst_82 {dimension_numbers = #tpu.dot_dimension_numbers<[1], [0], [0], [1], [0, 0, 1, 1], [], []>} : vector<1x64xf32>, vector<64x192xf32>, vector<1x192xf32> -> vector<1x192xf32>
    %323 = vector.extract_strided_slice %287 {offsets = [1, 0], sizes = [1, 192], strides = [1, 1]} : vector<8x192xf32> to vector<1x192xf32>
    %324 = vector.extract_strided_slice %323 {offsets = [0, 0], sizes = [1, 64], strides = [1, 1]} : vector<1x192xf32> to vector<1x64xf32>
    %325 = vector.extract_strided_slice %322 {offsets = [0, 0], sizes = [1, 64], strides = [1, 1]} : vector<1x192xf32> to vector<1x64xf32>
    %326 = arith.addf %324, %325 : vector<1x64xf32>
    %327 = arith.negf %326 : vector<1x64xf32>
    %328 = math.exp %327 : vector<1x64xf32>
    %cst_83 = arith.constant 1.000000e+00 : f32
    %329 = vector.broadcast %cst_83 : f32 to vector<1x64xf32>
    %330 = arith.addf %329, %328 : vector<1x64xf32>
    %331 = arith.divf %329, %330 : vector<1x64xf32>
    %332 = vector.extract_strided_slice %323 {offsets = [0, 64], sizes = [1, 64], strides = [1, 1]} : vector<1x192xf32> to vector<1x64xf32>
    %333 = vector.extract_strided_slice %322 {offsets = [0, 64], sizes = [1, 64], strides = [1, 1]} : vector<1x192xf32> to vector<1x64xf32>
    %334 = arith.addf %332, %333 : vector<1x64xf32>
    %335 = arith.negf %334 : vector<1x64xf32>
    %336 = math.exp %335 : vector<1x64xf32>
    %cst_84 = arith.constant 1.000000e+00 : f32
    %337 = vector.broadcast %cst_84 : f32 to vector<1x64xf32>
    %338 = arith.addf %337, %336 : vector<1x64xf32>
    %339 = arith.divf %337, %338 : vector<1x64xf32>
    %340 = vector.extract_strided_slice %323 {offsets = [0, 128], sizes = [1, 64], strides = [1, 1]} : vector<1x192xf32> to vector<1x64xf32>
    %341 = vector.extract_strided_slice %322 {offsets = [0, 128], sizes = [1, 64], strides = [1, 1]} : vector<1x192xf32> to vector<1x64xf32>
    %342 = arith.addf %341, %290 : vector<1x64xf32>
    %343 = arith.mulf %331, %342 : vector<1x64xf32>
    %344 = arith.addf %340, %343 : vector<1x64xf32>
    %345 = math.tanh %344 : vector<1x64xf32>
    %cst_85 = arith.constant 1.000000e+00 : f32
    %346 = vector.broadcast %cst_85 : f32 to vector<1x64xf32>
    %347 = arith.subf %346, %339 : vector<1x64xf32>
    %348 = arith.mulf %347, %345 : vector<1x64xf32>
    %349 = arith.mulf %339, %320 : vector<1x64xf32>
    %350 = arith.addf %348, %349 : vector<1x64xf32>
    %c1_86 = arith.constant 1 : index
    %c0_87 = arith.constant 0 : index
    %351 = vector.load %arg9[%c1_86, %c0_87] : memref<8x64xf32, #tpu.memory_space<vmem>>, vector<1x64xf32>
    tpu.vector_store %arg9[%c1_86, %c0_87], %350 {strides = array<i32>} : memref<8x64xf32, #tpu.memory_space<vmem>>, vector<1x64xf32>,
    %cst_88 = arith.constant dense<0.000000e+00> : vector<1x192xf32>
    %352 = tpu.matmul %350, %289, %cst_88 {dimension_numbers = #tpu.dot_dimension_numbers<[1], [0], [0], [1], [0, 0, 1, 1], [], []>} : vector<1x64xf32>, vector<64x192xf32>, vector<1x192xf32> -> vector<1x192xf32>
    %353 = vector.extract_strided_slice %287 {offsets = [2, 0], sizes = [1, 192], strides = [1, 1]} : vector<8x192xf32> to vector<1x192xf32>
    %354 = vector.extract_strided_slice %353 {offsets = [0, 0], sizes = [1, 64], strides = [1, 1]} : vector<1x192xf32> to vector<1x64xf32>
    %355 = vector.extract_strided_slice %352 {offsets = [0, 0], sizes = [1, 64], strides = [1, 1]} : vector<1x192xf32> to vector<1x64xf32>
    %356 = arith.addf %354, %355 : vector<1x64xf32>
    %357 = arith.negf %356 : vector<1x64xf32>
    %358 = math.exp %357 : vector<1x64xf32>
    %cst_89 = arith.constant 1.000000e+00 : f32
    %359 = vector.broadcast %cst_89 : f32 to vector<1x64xf32>
    %360 = arith.addf %359, %358 : vector<1x64xf32>
    %361 = arith.divf %359, %360 : vector<1x64xf32>
    %362 = vector.extract_strided_slice %353 {offsets = [0, 64], sizes = [1, 64], strides = [1, 1]} : vector<1x192xf32> to vector<1x64xf32>
    %363 = vector.extract_strided_slice %352 {offsets = [0, 64], sizes = [1, 64], strides = [1, 1]} : vector<1x192xf32> to vector<1x64xf32>
    %364 = arith.addf %362, %363 : vector<1x64xf32>
    %365 = arith.negf %364 : vector<1x64xf32>
    %366 = math.exp %365 : vector<1x64xf32>
    %cst_90 = arith.constant 1.000000e+00 : f32
    %367 = vector.broadcast %cst_90 : f32 to vector<1x64xf32>
    %368 = arith.addf %367, %366 : vector<1x64xf32>
    %369 = arith.divf %367, %368 : vector<1x64xf32>
    %370 = vector.extract_strided_slice %353 {offsets = [0, 128], sizes = [1, 64], strides = [1, 1]} : vector<1x192xf32> to vector<1x64xf32>
    %371 = vector.extract_strided_slice %352 {offsets = [0, 128], sizes = [1, 64], strides = [1, 1]} : vector<1x192xf32> to vector<1x64xf32>
    %372 = arith.addf %371, %290 : vector<1x64xf32>
    %373 = arith.mulf %361, %372 : vector<1x64xf32>
    %374 = arith.addf %370, %373 : vector<1x64xf32>
    %375 = math.tanh %374 : vector<1x64xf32>
    %cst_91 = arith.constant 1.000000e+00 : f32
    %376 = vector.broadcast %cst_91 : f32 to vector<1x64xf32>
    %377 = arith.subf %376, %369 : vector<1x64xf32>
    %378 = arith.mulf %377, %375 : vector<1x64xf32>
    %379 = arith.mulf %369, %350 : vector<1x64xf32>
    %380 = arith.addf %378, %379 : vector<1x64xf32>
    %c2_92 = arith.constant 2 : index
    %c0_93 = arith.constant 0 : index
    %381 = vector.load %arg9[%c2_92, %c0_93] : memref<8x64xf32, #tpu.memory_space<vmem>>, vector<1x64xf32>
    tpu.vector_store %arg9[%c2_92, %c0_93], %380 {strides = array<i32>} : memref<8x64xf32, #tpu.memory_space<vmem>>, vector<1x64xf32>,
    %cst_94 = arith.constant dense<0.000000e+00> : vector<1x192xf32>
    %382 = tpu.matmul %380, %289, %cst_94 {dimension_numbers = #tpu.dot_dimension_numbers<[1], [0], [0], [1], [0, 0, 1, 1], [], []>} : vector<1x64xf32>, vector<64x192xf32>, vector<1x192xf32> -> vector<1x192xf32>
    %383 = vector.extract_strided_slice %287 {offsets = [3, 0], sizes = [1, 192], strides = [1, 1]} : vector<8x192xf32> to vector<1x192xf32>
    %384 = vector.extract_strided_slice %383 {offsets = [0, 0], sizes = [1, 64], strides = [1, 1]} : vector<1x192xf32> to vector<1x64xf32>
    %385 = vector.extract_strided_slice %382 {offsets = [0, 0], sizes = [1, 64], strides = [1, 1]} : vector<1x192xf32> to vector<1x64xf32>
    %386 = arith.addf %384, %385 : vector<1x64xf32>
    %387 = arith.negf %386 : vector<1x64xf32>
    %388 = math.exp %387 : vector<1x64xf32>
    %cst_95 = arith.constant 1.000000e+00 : f32
    %389 = vector.broadcast %cst_95 : f32 to vector<1x64xf32>
    %390 = arith.addf %389, %388 : vector<1x64xf32>
    %391 = arith.divf %389, %390 : vector<1x64xf32>
    %392 = vector.extract_strided_slice %383 {offsets = [0, 64], sizes = [1, 64], strides = [1, 1]} : vector<1x192xf32> to vector<1x64xf32>
    %393 = vector.extract_strided_slice %382 {offsets = [0, 64], sizes = [1, 64], strides = [1, 1]} : vector<1x192xf32> to vector<1x64xf32>
    %394 = arith.addf %392, %393 : vector<1x64xf32>
    %395 = arith.negf %394 : vector<1x64xf32>
    %396 = math.exp %395 : vector<1x64xf32>
    %cst_96 = arith.constant 1.000000e+00 : f32
    %397 = vector.broadcast %cst_96 : f32 to vector<1x64xf32>
    %398 = arith.addf %397, %396 : vector<1x64xf32>
    %399 = arith.divf %397, %398 : vector<1x64xf32>
    %400 = vector.extract_strided_slice %383 {offsets = [0, 128], sizes = [1, 64], strides = [1, 1]} : vector<1x192xf32> to vector<1x64xf32>
    %401 = vector.extract_strided_slice %382 {offsets = [0, 128], sizes = [1, 64], strides = [1, 1]} : vector<1x192xf32> to vector<1x64xf32>
    %402 = arith.addf %401, %290 : vector<1x64xf32>
    %403 = arith.mulf %391, %402 : vector<1x64xf32>
    %404 = arith.addf %400, %403 : vector<1x64xf32>
    %405 = math.tanh %404 : vector<1x64xf32>
    %cst_97 = arith.constant 1.000000e+00 : f32
    %406 = vector.broadcast %cst_97 : f32 to vector<1x64xf32>
    %407 = arith.subf %406, %399 : vector<1x64xf32>
    %408 = arith.mulf %407, %405 : vector<1x64xf32>
    %409 = arith.mulf %399, %380 : vector<1x64xf32>
    %410 = arith.addf %408, %409 : vector<1x64xf32>
    %c3_98 = arith.constant 3 : index
    %c0_99 = arith.constant 0 : index
    %411 = vector.load %arg9[%c3_98, %c0_99] : memref<8x64xf32, #tpu.memory_space<vmem>>, vector<1x64xf32>
    tpu.vector_store %arg9[%c3_98, %c0_99], %410 {strides = array<i32>} : memref<8x64xf32, #tpu.memory_space<vmem>>, vector<1x64xf32>,
    %cst_100 = arith.constant dense<0.000000e+00> : vector<1x192xf32>
    %412 = tpu.matmul %410, %289, %cst_100 {dimension_numbers = #tpu.dot_dimension_numbers<[1], [0], [0], [1], [0, 0, 1, 1], [], []>} : vector<1x64xf32>, vector<64x192xf32>, vector<1x192xf32> -> vector<1x192xf32>
    %413 = vector.extract_strided_slice %287 {offsets = [4, 0], sizes = [1, 192], strides = [1, 1]} : vector<8x192xf32> to vector<1x192xf32>
    %414 = vector.extract_strided_slice %413 {offsets = [0, 0], sizes = [1, 64], strides = [1, 1]} : vector<1x192xf32> to vector<1x64xf32>
    %415 = vector.extract_strided_slice %412 {offsets = [0, 0], sizes = [1, 64], strides = [1, 1]} : vector<1x192xf32> to vector<1x64xf32>
    %416 = arith.addf %414, %415 : vector<1x64xf32>
    %417 = arith.negf %416 : vector<1x64xf32>
    %418 = math.exp %417 : vector<1x64xf32>
    %cst_101 = arith.constant 1.000000e+00 : f32
    %419 = vector.broadcast %cst_101 : f32 to vector<1x64xf32>
    %420 = arith.addf %419, %418 : vector<1x64xf32>
    %421 = arith.divf %419, %420 : vector<1x64xf32>
    %422 = vector.extract_strided_slice %413 {offsets = [0, 64], sizes = [1, 64], strides = [1, 1]} : vector<1x192xf32> to vector<1x64xf32>
    %423 = vector.extract_strided_slice %412 {offsets = [0, 64], sizes = [1, 64], strides = [1, 1]} : vector<1x192xf32> to vector<1x64xf32>
    %424 = arith.addf %422, %423 : vector<1x64xf32>
    %425 = arith.negf %424 : vector<1x64xf32>
    %426 = math.exp %425 : vector<1x64xf32>
    %cst_102 = arith.constant 1.000000e+00 : f32
    %427 = vector.broadcast %cst_102 : f32 to vector<1x64xf32>
    %428 = arith.addf %427, %426 : vector<1x64xf32>
    %429 = arith.divf %427, %428 : vector<1x64xf32>
    %430 = vector.extract_strided_slice %413 {offsets = [0, 128], sizes = [1, 64], strides = [1, 1]} : vector<1x192xf32> to vector<1x64xf32>
    %431 = vector.extract_strided_slice %412 {offsets = [0, 128], sizes = [1, 64], strides = [1, 1]} : vector<1x192xf32> to vector<1x64xf32>
    %432 = arith.addf %431, %290 : vector<1x64xf32>
    %433 = arith.mulf %421, %432 : vector<1x64xf32>
    %434 = arith.addf %430, %433 : vector<1x64xf32>
    %435 = math.tanh %434 : vector<1x64xf32>
    %cst_103 = arith.constant 1.000000e+00 : f32
    %436 = vector.broadcast %cst_103 : f32 to vector<1x64xf32>
    %437 = arith.subf %436, %429 : vector<1x64xf32>
    %438 = arith.mulf %437, %435 : vector<1x64xf32>
    %439 = arith.mulf %429, %410 : vector<1x64xf32>
    %440 = arith.addf %438, %439 : vector<1x64xf32>
    %c4_104 = arith.constant 4 : index
    %c0_105 = arith.constant 0 : index
    %441 = vector.load %arg9[%c4_104, %c0_105] : memref<8x64xf32, #tpu.memory_space<vmem>>, vector<1x64xf32>
    tpu.vector_store %arg9[%c4_104, %c0_105], %440 {strides = array<i32>} : memref<8x64xf32, #tpu.memory_space<vmem>>, vector<1x64xf32>,
    %cst_106 = arith.constant dense<0.000000e+00> : vector<1x192xf32>
    %442 = tpu.matmul %440, %289, %cst_106 {dimension_numbers = #tpu.dot_dimension_numbers<[1], [0], [0], [1], [0, 0, 1, 1], [], []>} : vector<1x64xf32>, vector<64x192xf32>, vector<1x192xf32> -> vector<1x192xf32>
    %443 = vector.extract_strided_slice %287 {offsets = [5, 0], sizes = [1, 192], strides = [1, 1]} : vector<8x192xf32> to vector<1x192xf32>
    %444 = vector.extract_strided_slice %443 {offsets = [0, 0], sizes = [1, 64], strides = [1, 1]} : vector<1x192xf32> to vector<1x64xf32>
    %445 = vector.extract_strided_slice %442 {offsets = [0, 0], sizes = [1, 64], strides = [1, 1]} : vector<1x192xf32> to vector<1x64xf32>
    %446 = arith.addf %444, %445 : vector<1x64xf32>
    %447 = arith.negf %446 : vector<1x64xf32>
    %448 = math.exp %447 : vector<1x64xf32>
    %cst_107 = arith.constant 1.000000e+00 : f32
    %449 = vector.broadcast %cst_107 : f32 to vector<1x64xf32>
    %450 = arith.addf %449, %448 : vector<1x64xf32>
    %451 = arith.divf %449, %450 : vector<1x64xf32>
    %452 = vector.extract_strided_slice %443 {offsets = [0, 64], sizes = [1, 64], strides = [1, 1]} : vector<1x192xf32> to vector<1x64xf32>
    %453 = vector.extract_strided_slice %442 {offsets = [0, 64], sizes = [1, 64], strides = [1, 1]} : vector<1x192xf32> to vector<1x64xf32>
    %454 = arith.addf %452, %453 : vector<1x64xf32>
    %455 = arith.negf %454 : vector<1x64xf32>
    %456 = math.exp %455 : vector<1x64xf32>
    %cst_108 = arith.constant 1.000000e+00 : f32
    %457 = vector.broadcast %cst_108 : f32 to vector<1x64xf32>
    %458 = arith.addf %457, %456 : vector<1x64xf32>
    %459 = arith.divf %457, %458 : vector<1x64xf32>
    %460 = vector.extract_strided_slice %443 {offsets = [0, 128], sizes = [1, 64], strides = [1, 1]} : vector<1x192xf32> to vector<1x64xf32>
    %461 = vector.extract_strided_slice %442 {offsets = [0, 128], sizes = [1, 64], strides = [1, 1]} : vector<1x192xf32> to vector<1x64xf32>
    %462 = arith.addf %461, %290 : vector<1x64xf32>
    %463 = arith.mulf %451, %462 : vector<1x64xf32>
    %464 = arith.addf %460, %463 : vector<1x64xf32>
    %465 = math.tanh %464 : vector<1x64xf32>
    %cst_109 = arith.constant 1.000000e+00 : f32
    %466 = vector.broadcast %cst_109 : f32 to vector<1x64xf32>
    %467 = arith.subf %466, %459 : vector<1x64xf32>
    %468 = arith.mulf %467, %465 : vector<1x64xf32>
    %469 = arith.mulf %459, %440 : vector<1x64xf32>
    %470 = arith.addf %468, %469 : vector<1x64xf32>
    %c5_110 = arith.constant 5 : index
    %c0_111 = arith.constant 0 : index
    %471 = vector.load %arg9[%c5_110, %c0_111] : memref<8x64xf32, #tpu.memory_space<vmem>>, vector<1x64xf32>
    tpu.vector_store %arg9[%c5_110, %c0_111], %470 {strides = array<i32>} : memref<8x64xf32, #tpu.memory_space<vmem>>, vector<1x64xf32>,
    %cst_112 = arith.constant dense<0.000000e+00> : vector<1x192xf32>
    %472 = tpu.matmul %470, %289, %cst_112 {dimension_numbers = #tpu.dot_dimension_numbers<[1], [0], [0], [1], [0, 0, 1, 1], [], []>} : vector<1x64xf32>, vector<64x192xf32>, vector<1x192xf32> -> vector<1x192xf32>
    %473 = vector.extract_strided_slice %287 {offsets = [6, 0], sizes = [1, 192], strides = [1, 1]} : vector<8x192xf32> to vector<1x192xf32>
    %474 = vector.extract_strided_slice %473 {offsets = [0, 0], sizes = [1, 64], strides = [1, 1]} : vector<1x192xf32> to vector<1x64xf32>
    %475 = vector.extract_strided_slice %472 {offsets = [0, 0], sizes = [1, 64], strides = [1, 1]} : vector<1x192xf32> to vector<1x64xf32>
    %476 = arith.addf %474, %475 : vector<1x64xf32>
    %477 = arith.negf %476 : vector<1x64xf32>
    %478 = math.exp %477 : vector<1x64xf32>
    %cst_113 = arith.constant 1.000000e+00 : f32
    %479 = vector.broadcast %cst_113 : f32 to vector<1x64xf32>
    %480 = arith.addf %479, %478 : vector<1x64xf32>
    %481 = arith.divf %479, %480 : vector<1x64xf32>
    %482 = vector.extract_strided_slice %473 {offsets = [0, 64], sizes = [1, 64], strides = [1, 1]} : vector<1x192xf32> to vector<1x64xf32>
    %483 = vector.extract_strided_slice %472 {offsets = [0, 64], sizes = [1, 64], strides = [1, 1]} : vector<1x192xf32> to vector<1x64xf32>
    %484 = arith.addf %482, %483 : vector<1x64xf32>
    %485 = arith.negf %484 : vector<1x64xf32>
    %486 = math.exp %485 : vector<1x64xf32>
    %cst_114 = arith.constant 1.000000e+00 : f32
    %487 = vector.broadcast %cst_114 : f32 to vector<1x64xf32>
    %488 = arith.addf %487, %486 : vector<1x64xf32>
    %489 = arith.divf %487, %488 : vector<1x64xf32>
    %490 = vector.extract_strided_slice %473 {offsets = [0, 128], sizes = [1, 64], strides = [1, 1]} : vector<1x192xf32> to vector<1x64xf32>
    %491 = vector.extract_strided_slice %472 {offsets = [0, 128], sizes = [1, 64], strides = [1, 1]} : vector<1x192xf32> to vector<1x64xf32>
    %492 = arith.addf %491, %290 : vector<1x64xf32>
    %493 = arith.mulf %481, %492 : vector<1x64xf32>
    %494 = arith.addf %490, %493 : vector<1x64xf32>
    %495 = math.tanh %494 : vector<1x64xf32>
    %cst_115 = arith.constant 1.000000e+00 : f32
    %496 = vector.broadcast %cst_115 : f32 to vector<1x64xf32>
    %497 = arith.subf %496, %489 : vector<1x64xf32>
    %498 = arith.mulf %497, %495 : vector<1x64xf32>
    %499 = arith.mulf %489, %470 : vector<1x64xf32>
    %500 = arith.addf %498, %499 : vector<1x64xf32>
    %c6_116 = arith.constant 6 : index
    %c0_117 = arith.constant 0 : index
    %501 = vector.load %arg9[%c6_116, %c0_117] : memref<8x64xf32, #tpu.memory_space<vmem>>, vector<1x64xf32>
    tpu.vector_store %arg9[%c6_116, %c0_117], %500 {strides = array<i32>} : memref<8x64xf32, #tpu.memory_space<vmem>>, vector<1x64xf32>,
    %cst_118 = arith.constant dense<0.000000e+00> : vector<1x192xf32>
    %502 = tpu.matmul %500, %289, %cst_118 {dimension_numbers = #tpu.dot_dimension_numbers<[1], [0], [0], [1], [0, 0, 1, 1], [], []>} : vector<1x64xf32>, vector<64x192xf32>, vector<1x192xf32> -> vector<1x192xf32>
    %503 = vector.extract_strided_slice %287 {offsets = [7, 0], sizes = [1, 192], strides = [1, 1]} : vector<8x192xf32> to vector<1x192xf32>
    %504 = vector.extract_strided_slice %503 {offsets = [0, 0], sizes = [1, 64], strides = [1, 1]} : vector<1x192xf32> to vector<1x64xf32>
    %505 = vector.extract_strided_slice %502 {offsets = [0, 0], sizes = [1, 64], strides = [1, 1]} : vector<1x192xf32> to vector<1x64xf32>
    %506 = arith.addf %504, %505 : vector<1x64xf32>
    %507 = arith.negf %506 : vector<1x64xf32>
    %508 = math.exp %507 : vector<1x64xf32>
    %cst_119 = arith.constant 1.000000e+00 : f32
    %509 = vector.broadcast %cst_119 : f32 to vector<1x64xf32>
    %510 = arith.addf %509, %508 : vector<1x64xf32>
    %511 = arith.divf %509, %510 : vector<1x64xf32>
    %512 = vector.extract_strided_slice %503 {offsets = [0, 64], sizes = [1, 64], strides = [1, 1]} : vector<1x192xf32> to vector<1x64xf32>
    %513 = vector.extract_strided_slice %502 {offsets = [0, 64], sizes = [1, 64], strides = [1, 1]} : vector<1x192xf32> to vector<1x64xf32>
    %514 = arith.addf %512, %513 : vector<1x64xf32>
    %515 = arith.negf %514 : vector<1x64xf32>
    %516 = math.exp %515 : vector<1x64xf32>
    %cst_120 = arith.constant 1.000000e+00 : f32
    %517 = vector.broadcast %cst_120 : f32 to vector<1x64xf32>
    %518 = arith.addf %517, %516 : vector<1x64xf32>
    %519 = arith.divf %517, %518 : vector<1x64xf32>
    %520 = vector.extract_strided_slice %503 {offsets = [0, 128], sizes = [1, 64], strides = [1, 1]} : vector<1x192xf32> to vector<1x64xf32>
    %521 = vector.extract_strided_slice %502 {offsets = [0, 128], sizes = [1, 64], strides = [1, 1]} : vector<1x192xf32> to vector<1x64xf32>
    %522 = arith.addf %521, %290 : vector<1x64xf32>
    %523 = arith.mulf %511, %522 : vector<1x64xf32>
    %524 = arith.addf %520, %523 : vector<1x64xf32>
    %525 = math.tanh %524 : vector<1x64xf32>
    %cst_121 = arith.constant 1.000000e+00 : f32
    %526 = vector.broadcast %cst_121 : f32 to vector<1x64xf32>
    %527 = arith.subf %526, %519 : vector<1x64xf32>
    %528 = arith.mulf %527, %525 : vector<1x64xf32>
    %529 = arith.mulf %519, %500 : vector<1x64xf32>
    %530 = arith.addf %528, %529 : vector<1x64xf32>
    %c7_122 = arith.constant 7 : index
    %c0_123 = arith.constant 0 : index
    %531 = vector.load %arg9[%c7_122, %c0_123] : memref<8x64xf32, #tpu.memory_space<vmem>>, vector<1x64xf32>
    tpu.vector_store %arg9[%c7_122, %c0_123], %530 {strides = array<i32>} : memref<8x64xf32, #tpu.memory_space<vmem>>, vector<1x64xf32>,
    %c0_124 = arith.constant 0 : index
    %c0_125 = arith.constant 0 : index
    %532 = vector.load %arg9[%c0_124, %c0_125] : memref<8x64xf32, #tpu.memory_space<vmem>>, vector<8x64xf32>
    %cst_126 = arith.constant dense<0.000000e+00> : vector<8x64xf32>
    %533 = tpu.matmul %24, %532, %cst_126 {dimension_numbers = #tpu.dot_dimension_numbers<[1], [0], [0], [1], [0, 0, 1, 1], [], []>} : vector<8x8xf32>, vector<8x64xf32>, vector<8x64xf32> -> vector<8x64xf32>
    %534 = vector.extract_strided_slice %532 {offsets = [0, 0], sizes = [8, 32], strides = [1, 1]} : vector<8x64xf32> to vector<8x32xf32>
    %535 = vector.extract_strided_slice %533 {offsets = [0, 32], sizes = [8, 32], strides = [1, 1]} : vector<8x64xf32> to vector<8x32xf32>
    %536 = arith.addf %534, %535 : vector<8x32xf32>
    %c0_127 = arith.constant 0 : index
    %c0_128 = arith.constant 0 : index
    %537 = vector.load %arg6[%c0_127, %c0_128] : memref<8x32xf32, #tpu.memory_space<vmem>>, vector<8x32xf32>
    tpu.vector_store %arg6[%c0_127, %c0_128], %536 {strides = array<i32>} : memref<8x32xf32, #tpu.memory_space<vmem>>, vector<8x32xf32>,
    %538 = tpu.concatenate %276, %530 in 0 : vector<1x64xf32>, vector<1x64xf32> -> vector<2x64xf32>
    %c0_129 = arith.constant 0 : index
    %c0_130 = arith.constant 0 : index
    %539 = vector.load %arg7[%c0_129, %c0_130] : memref<2x64xf32, #tpu.memory_space<vmem>>, vector<2x64xf32>
    tpu.vector_store %arg7[%c0_129, %c0_130], %538 {strides = array<i32>} : memref<2x64xf32, #tpu.memory_space<vmem>>, vector<2x64xf32>,
    return
  }
}

</mosaic_0001>

<bundles_post_ra>
// kernel: rnn_en_forward.1
= control target key start
LH: loop header
LB: loop body
LE: loop exit
PB: predicated region body
PF: predicated region fallthrough
CT: control target
= control target key end

     0   :  { %v3025_v3 = vmov 0   ;;  %v3026_v4 = vmov 0.0|0.0   ;;  %s3726_s0 = inlined_call_operand.vmem [shape: s32[8,1], index: 0, kind: input, shape index: {}]   ;;  %s3727_s1 = inlined_call_operand.vmem [shape: f32[16,16], index: 1, kind: input, shape index: {}]   ;;  %s3728_s2 = inlined_call_operand.vmem [shape: f32[32,192], index: 2, kind: input, shape index: {}]   ;;  %s3729_s3 = inlined_call_operand.vmem [shape: f32[128,192], index: 3, kind: input, shape index: {}]   ;;  %s3730_s4 = inlined_call_operand.vmem [shape: f32[2,64,192], index: 4, kind: input, shape index: {}]   ;;  %s3731_s5 = inlined_call_operand.vmem [shape: f32[2,256], index: 5, kind: input, shape index: {}]   ;;  %s3732_s6 = inlined_call_operand.hbm [shape: f32[8,32], index: 6, kind: output, shape index: {0}]   ;;  %s3733_s7 = inlined_call_operand.vmem [shape: f32[2,64], index: 7, kind: output, shape index: {1}]  }
   0x1   :  { %v26_v0 = vld [vmem:[%s3726_s0] sm:$0xff]  ;;  %v36_v2 = vld [vmem:[%s3727_s1 + $0x8] sm:$0xff]  ;;  %2902 = vset.pattern.permute.xlu0 %v3025_v3  ;;  %2592 = vmatprep.subr.bf16.mxu0 %v3026_v4 }
   0x2   :  { %v35_v1 = vld [vmem:[%s3727_s1] sm:$0xff] }
   0x3   :  { %v2593_v5 = vpack.c.bf16 %v36_v2, %v35_v1 }
   0x4   :  { %13 = vsyncpa [#allocation5], 0  ;;  %30 = vperm.xlu0 %2902, %v26_v0   ;;  %v3027_v6 = vmov 0.0   ;;  %vm3028_vm0 = vmmov 0   ;;  %v27_v7 = vlaneseq  ;;  %vm37_vm1 = vcmask 130048   ;;  %v370_v15 = vld [vmem:[%s3730_s4 + $0x8] sm:$0xff] }
   0x5   :  { %2577 = vmatprep.subr.mxu1 %v3027_v6  ;;  %2594 = vmatpush3.bf16.msra.mxu0 %v2593_v5  ;;  %v372_v16 = vld [vmem:[%s3730_s4 + $0x18] sm:$0xff]  ;;  %v369_v17 = vld [vmem:[%s3730_s4] sm:$0xff]  ;;  %v371_v19 = vld [vmem:[%s3730_s4 + $0x10] sm:$0xff]  ;;  %vm125_vm5 = vcmask 64512   ;;  %s3029_s26 = smov 64   ;;  %vm492_vm6 = vcmask 516096  }
   0x6   :  { %2574 = vmatprep.mubr.msk.f32.mxu0 %vm3028_vm0, %v3027_v6  ;;  %2579 = vmatprep.mubr.msk.f32.mxu1 %vm3028_vm0, %v3027_v6  ;;  %v28_v8 = vand.u32 127, %v27_v7  ;;  %v3099_v18 = vpack.c.bf16 %v372_v16, %v370_v15  ;;  %v3104_v20 = vpack.c.bf16 %v371_v19, %v369_v17  ;;  %v374_v21 = vld [vmem:[%s3730_s4 + $0x28] sm:$0xff]  ;;  %v376_v22 = vld [vmem:[%s3730_s4 + $0x38] sm:$0xff]  ;;  %v373_v23 = vld [vmem:[%s3730_s4 + $0x20] sm:$0xff]  ;;  %v3126_v28 = vshrl.u32 %v27_v7, 7 }
   0x7   :  { %v375_v24 = vld [vmem:[%s3730_s4 + $0x30] sm:$0xff]  ;;  %v3120_v25 = vpack.c.bf16 %v376_v22, %v374_v21  ;;  %v204_v30 = vld [vmem:[%s3728_s2 + $0x28] sm:$0xff]  ;;  %v206_v31 = vld [vmem:[%s3728_s2 + $0x38] sm:$0xff]  ;;  %vm386_vm7 = vcmask 523264   ;;  %vm598_vm8 = vcmask 517121   ;;  %vm816_vm9 = vcmask 519171  }
   0x8   :  { %2604 = vmatprep.subr.bf16.mxu0 %v3099_v18  ;;  %v3122_v26 = vpack.c.bf16 %v375_v24, %v373_v23  ;;  %v121_v29 = vadd.s32 %v3126_v28, %v28_v8  ;;  %v203_v32 = vld [vmem:[%s3728_s2 + $0x20] sm:$0xff]  ;;  %v205_v33 = vld [vmem:[%s3728_s2 + $0x30] sm:$0xff]  ;;  %v2595_v36 = vpack.c.bf16 %v206_v31, %v204_v30  ;;  %v378_v40 = vld [vmem:[%s3730_s4 + $0x48] sm:$0xff]  ;;  %v359_v63 = vsub.s32 0, %v3126_v28 }
   0x9   :  { %v2597_v39 = vpack.c.bf16 %v205_v33, %v203_v32  ;;  %v380_v41 = vld [vmem:[%s3730_s4 + $0x58] sm:$0xff]  ;;  %v377_v43 = vld [vmem:[%s3730_s4 + $0x40] sm:$0xff]  ;;  %v379_v44 = vld [vmem:[%s3730_s4 + $0x50] sm:$0xff]  ;;  %vm1034_vm10 = vcmask 521221   ;;  %vm707_vm11 = vcmask 518146   ;;  %vm925_vm12 = vcmask 520196  }
   0xa   :  { %vm122_vm3 = vcmp.eq.s32.totalorder %v121_v29, 7  ;;  %v3153_v42 = vpack.c.bf16 %v380_v41, %v378_v40  ;;  %v200_v45 = vld [vmem:[%s3728_s2 + $0x8] sm:$0xff]  ;;  %v202_v46 = vld [vmem:[%s3728_s2 + $0x18] sm:$0xff]  ;;  %v3167_v47 = vpack.c.bf16 %v379_v44, %v377_v43  ;;  %v381_v52 = vld [vmem:[%s3730_s4 + $0x60] sm:$0xff]  ;;  %vm1143_vm13 = vcmask 522246  }
   0xb   :  { %v3142_v38 = vsel %vm122_vm3, 1.0, %v3027_v6  ;;  %v2599_v48 = vpack.c.bf16 %v202_v46, %v200_v45  ;;  %v382_v49 = vld [vmem:[%s3730_s4 + $0x68] sm:$0xff]  ;;  %v384_v50 = vld [vmem:[%s3730_s4 + $0x78] sm:$0xff]  ;;  %v383_v53 = vld [vmem:[%s3730_s4 + $0x70] sm:$0xff]  ;;  %vm1252_vm14 = vcmask 523271   ;;  %vm2476_vm15 = vcmask 1040384  }
   0xc   :  { %v3177_v51 = vpack.c.bf16 %v384_v50, %v382_v49  ;;  %v3185_v54 = vpack.c.bf16 %v383_v53, %v381_v52  ;;  %v2509_v55 = vld [vmem:[%s3731_s5 + $0x2] ss:$0 sm:$0xff]  ;;  %v201_v57 = vld [vmem:[%s3728_s2 + $0x10] sm:$0xff] }
   0xd   :  { %473 = vrot.lane.b32.xlu1 %v2509_v55, %s3029_s26  ;;  %v199_v56 = vld [vmem:[%s3728_s2] sm:$0xff]  ;;  %s3030_s2 = smov 96  }
   0xe   :  { %v2601_v58 = vpack.c.bf16 %v201_v57, %v199_v56  ;;  %v355_v0 = vld [vmem:[%s3731_s5] ss:$2 sm:$0x3] }
   0xf   :  { %v360_v1 = vrot.slane %v355_v0, %v359_v63 }
  0x83   :  { %v31_v9 = vpop.permute.xlu0 %30 }
  0x84   :  { %vm32_vm2 = vcmp.eq.s32.totalorder %v28_v8, %v31_v9 }
  0x85   :  { %v2502_v10 = vsel %vm32_vm2, 1.0, %v3027_v6 }
  0x86   :  { %2575 = vmatmul.mubr.msk.f32.vlgmr.msra.gmra.mrb[0].mxu0 %vm37_vm1, %v2502_v10  ;;  %v363_v10 = vsub.s32 1, %v3126_v28 }
  0x87   :  { %454 = vmatprep.mubr.f32.mxu0 %v3027_v6  ;;  %2606 = vmatpush1.bf16.msra.mxu0 %v3104_v20 }
  0x88   :  { %2608 = vmatprep.subr.bf16.mxu0 %v3120_v25 }
  0x8b   :  { %2610 = vmatpush1.bf16.msra.mxu0 %v3122_v26 }
  0x8c   :  { %2612 = vmatprep.subr.bf16.mxu0 %v3153_v42 }
  0x8f   :  { %2614 = vmatpush1.bf16.msra.mxu0 %v3167_v47 }
  0x90   :  { %2616 = vmatprep.subr.bf16.mxu0 %v3177_v51 }
  0x93   :  { %2618 = vmatpush1.bf16.msra.mxu0 %v3185_v54 }
  0x94   :  { %2636 = vmatprep.subr.bf16.mxu0 %v3099_v18 }
  0x96   :  { %455 = vmatmul.mubr.f32.vlgmr.msra.gmra.mrb[2].mxu0 %v3027_v6 }
  0x97   :  { %2638 = vmatpush1.bf16.msra.mxu0 %v3104_v20  ;;  %669 = vmatprep.mubr.f32.mxu0 %v3027_v6 }
  0x98   :  { %2640 = vmatprep.subr.bf16.mxu0 %v3120_v25 }
  0x9b   :  { %2642 = vmatpush1.bf16.msra.mxu0 %v3122_v26 }
  0x9c   :  { %2644 = vmatprep.subr.bf16.mxu0 %v3153_v42 }
  0x9f   :  { %2646 = vmatpush1.bf16.msra.mxu0 %v3167_v47 }
  0xa0   :  { %2648 = vmatprep.subr.bf16.mxu0 %v3177_v51 }
  0xa3   :  { %2650 = vmatpush1.bf16.msra.mxu0 %v3185_v54 }
  0xa4   :  { %2668 = vmatprep.subr.bf16.mxu0 %v3099_v18 }
 0x159   :  { %v107_v11 = vpop.f32.mrb[0].mxu0 }
 0x15a   :  { %v111_v12 = vmul.f32 %v107_v11, %v107_v11  ;;  %v2576_v13 = vpop.f32.mrb[1].mxu0 }
 0x15c   :  { %v112_v14 = vsel %vm37_vm1, %v111_v12, 0.0  ;;  %v364_v12 = vrot.slane %v355_v0, %v363_v10 }
 0x15d   :  { %113 = vadd.xlane.f32.xlu0 %v112_v14 }
 0x169   :  { %v456_v61 = vpop.f32.mrb[2].mxu0 }
 0x16a   :  { %v458_v62 = vpop.f32.mrb[3].mxu0 }
 0x1ea   :  { %v114_v27 = vpop.xlane.xlu0 %113 }
 0x1eb   :  { %2903 = vrsqrt.f32 %v114_v27  ;;  %vm115_vm4 = vcmp.gt.f32.partialorder %v114_v27, 1.0 }
 0x1f5   :  { %v2904_v34 = vpop.eup %2903 }
 0x1f6   :  { %v117_v35 = vsel %vm115_vm4, %v2904_v34, 1.0 }
 0x1f7   :  { %v118_v37 = vmul.f32 %v117_v35, %v107_v11  ;;  %v3233_v11 = vpop.permute.xlu1 %473 }
 0x1f8   :  { %v476_v13 = vadd.f32 %v3233_v11, %v458_v62 }
 0x1f9   :  { %2578 = vmatpush3.msra.mxu1 %v118_v37 }
 0x1fa   :  { %2580 = vmatmul.mubr.msk.f32.vlgmr.msra.gmra.mrb[0].mxu1 %vm125_vm5, %v3142_v38  ;;  %2596 = vmatprep.subr.bf16.mxu1 %v2595_v36 }
 0x1fb   :  { %2598 = vmatpush1.bf16.msra.mxu1 %v2597_v39  ;;  %274 = vmatprep.mubr.f32.mxu1 %v3027_v6 }
 0x1fc   :  { %2600 = vmatprep.subr.bf16.mxu1 %v2599_v48 }
 0x2cd   :  { %v195_v59 = vpop.f32.mrb[0].mxu1 }
 0x2ce   :  { %v2581_v60 = vpop.f32.mrb[1].mxu1  ;;  %2506 = vmatmul.mubr.msk.f32.vlgmr.msra.gmra.mrb[2].mxu1 %vm37_vm1, %v195_v59 }
 0x2cf   :  { %2602 = vmatpush1.bf16.msra.mxu1 %v2601_v58  ;;  %348 = vmatprep.mubr.f32.mxu1 %v3027_v6 }
 0x2d0   :  { %2620 = vmatprep.subr.bf16.mxu1 %v3099_v18 }
 0x2d6   :  { %2507 = vmatmul.mubr.msk.f32.vlgmr.msra.gmra.mrb[2].mxu1 %vm37_vm1, %v118_v37  ;;  %vm2470_vm1 = vcmask 261120  }
 0x2d7   :  { %2622 = vmatpush1.bf16.msra.mxu1 %v3104_v20  ;;  %560 = vmatprep.mubr.f32.mxu1 %v3027_v6 }
 0x2d8   :  { %2624 = vmatprep.subr.bf16.mxu1 %v3120_v25 }
 0x2db   :  { %2626 = vmatpush1.bf16.msra.mxu1 %v3122_v26 }
 0x2dc   :  { %2628 = vmatprep.subr.bf16.mxu1 %v3153_v42 }
 0x2df   :  { %2630 = vmatpush1.bf16.msra.mxu1 %v3167_v47 }
 0x2e0   :  { %2632 = vmatprep.subr.bf16.mxu1 %v3177_v51 }
 0x2e3   :  { %2634 = vmatpush1.bf16.msra.mxu1 %v3185_v54 }
 0x2e4   :  { %2652 = vmatprep.subr.bf16.mxu1 %v3099_v18 }
 0x3a9   :  { %v350_v2 = vpop.f32.mrb[2].mxu1 }
 0x3aa   :  { %v3229_v3 = vadd.f32 %v360_v1, %v350_v2  ;;  %v352_v4 = vpop.f32.mrb[3].mxu1 }
 0x3ab   :  { %v3238_v15 = vadd.f32 %v364_v12, %v352_v4 }
 0x3ac   :  { %v461_v5 = vadd.f32 %v456_v61, %v3229_v3 }
 0x3ae   :  { %v2508_v7 = vmul.f32 -1.442695, %v461_v5 }
 0x3b0   :  { %2905 = vpow2.f32 %v2508_v7 }
 0x3ba   :  { %v2906_v8 = vpop.eup %2905 }
 0x3bb   :  { %v465_v9 = vadd.f32 1.0, %v2906_v8 }
 0x3bd   :  { %2907 = vrcp.f32 %v465_v9 }
 0x3c7   :  { %v2908_v14 = vpop.eup %2907 }
 0x3c8   :  { %v477_v16 = vmul.f32 %v2908_v14, %v476_v13  ;;  %v480_v21 = vsub.f32 1.0, %v2908_v14  ;;  %v486_v23 = vmul.f32 0.0, %v2908_v14 }
 0x3ca   :  { %v478_v17 = vadd.f32 %v477_v16, %v3238_v15 }
 0x3cc   :  { %2909 = vtanh.f32 %v478_v17 }
 0x3d6   :  { %v2910_v19 = vpop.eup %2909 }
 0x3d7   :  { %482 = vrot.lane.b32.xlu1 %v2910_v19, %s3029_s26 }
 0x449   :  { %v483_v22 = vpop.permute.xlu1 %482 }
 0x44a   :  { %v485_v24 = vmul.f32 %v483_v22, %v480_v21 }
 0x44c   :  { %v487_v27 = vadd.f32 %v486_v23, %v485_v24 }
 0x44e   :  { %489 = vrot.lane.b32.xlu1 %v487_v27, %s3029_s26  ;;  %v590_v39 = vrot.slane %v487_v27, 7 }
 0x4c0   :  { %v490_v29 = vpop.permute.xlu1 %489 }
 0x4c1   :  { %493 = vst.msk [vmem:[#allocation2] sm:$0x1] %vm492_vm6, %v490_v29  ;;  %2510 = vmatmul.mubr.msk.f32.vlgmr.msra.gmra.mrb[4].mxu1 %vm386_vm7, %v490_v29 }
 0x4c2   :  { %2654 = vmatpush1.bf16.msra.mxu1 %v3104_v20  ;;  %778 = vmatprep.mubr.f32.mxu1 %v3027_v6 }
 0x4c3   :  { %2656 = vmatprep.subr.bf16.mxu1 %v3120_v25 }
 0x4c6   :  { %2658 = vmatpush1.bf16.msra.mxu1 %v3122_v26 }
 0x4c7   :  { %2660 = vmatprep.subr.bf16.mxu1 %v3153_v42 }
 0x4ca   :  { %2662 = vmatpush1.bf16.msra.mxu1 %v3167_v47 }
 0x4cb   :  { %2664 = vmatprep.subr.bf16.mxu1 %v3177_v51 }
 0x4ce   :  { %2666 = vmatpush1.bf16.msra.mxu1 %v3185_v54 }
 0x4cf   :  { %2684 = vmatprep.subr.bf16.mxu1 %v3099_v18 }
 0x594   :  { %v562_v30 = vpop.f32.mrb[4].mxu1 }
 0x595   :  { %v568_v31 = vrot.slane %v562_v30, 7  ;;  %v564_v32 = vpop.f32.mrb[5].mxu1 }
 0x596   :  { %v577_v37 = vadd.f32 %v564_v32, %v3233_v11 }
 0x597   :  { %v570_v33 = vadd.f32 %v568_v31, %v3229_v3 }
 0x598   :  { %v579_v40 = vrot.slane %v577_v37, 7 }
 0x599   :  { %v2511_v34 = vmul.f32 -1.442695, %v570_v33 }
 0x59b   :  { %2911 = vpow2.f32 %v2511_v34 }
 0x5a5   :  { %v2912_v35 = vpop.eup %2911 }
 0x5a6   :  { %v574_v36 = vadd.f32 1.0, %v2912_v35 }
 0x5a8   :  { %2913 = vrcp.f32 %v574_v36 }
 0x5b2   :  { %v2914_v41 = vpop.eup %2913 }
 0x5b3   :  { %v581_v43 = vmul.f32 %v2914_v41, %v579_v40  ;;  %v592_v44 = vmul.f32 %v2914_v41, %v590_v39  ;;  %v584_v48 = vsub.f32 1.0, %v2914_v41 }
 0x5b5   :  { %v582_v45 = vadd.f32 %v581_v43, %v3238_v15 }
 0x5b7   :  { %2915 = vtanh.f32 %v582_v45 }
 0x5c1   :  { %v2916_v46 = vpop.eup %2915 }
 0x5c2   :  { %586 = vrot.lane.b32.xlu1 %v2916_v46, %s3029_s26 }
 0x634   :  { %v587_v49 = vpop.permute.xlu1 %586 }
 0x635   :  { %v589_v50 = vmul.f32 %v587_v49, %v584_v48 }
 0x637   :  { %v3258_v52 = vadd.f32 %v592_v44, %v589_v50 }
 0x639   :  { %v600_v53 = vrot.slane %v3258_v52, 1  ;;  %v699_v9 = vrot.slane %v3258_v52, 7 }
 0x63b   :  { %601 = vrot.lane.b32.xlu1 %v600_v53, %s3029_s26 }
 0x6ad   :  { %v602_v55 = vpop.permute.xlu1 %601 }
 0x6ae   :  { %2512 = vmatmul.mubr.msk.f32.vlgmr.msra.gmra.mrb[4].mxu0 %vm386_vm7, %v602_v55 }
 0x6af   :  { %2670 = vmatpush1.bf16.msra.mxu0 %v3104_v20  ;;  %887 = vmatprep.mubr.f32.mxu0 %v3027_v6 }
 0x6b0   :  { %2672 = vmatprep.subr.bf16.mxu0 %v3120_v25 }
 0x6b3   :  { %2674 = vmatpush1.bf16.msra.mxu0 %v3122_v26 }
 0x6b4   :  { %2676 = vmatprep.subr.bf16.mxu0 %v3153_v42 }
 0x6b7   :  { %2678 = vmatpush1.bf16.msra.mxu0 %v3167_v47 }
 0x6b8   :  { %2680 = vmatprep.subr.bf16.mxu0 %v3177_v51 }
 0x6bb   :  { %2682 = vmatpush1.bf16.msra.mxu0 %v3185_v54 }
 0x6bc   :  { %2700 = vmatprep.subr.bf16.mxu0 %v3099_v18 }
 0x781   :  { %v671_v56 = vpop.f32.mrb[4].mxu0 }
 0x782   :  { %v677_v57 = vrot.slane %v671_v56, 6  ;;  %v673_v58 = vpop.f32.mrb[5].mxu0 }
 0x783   :  { %v686_v0 = vadd.f32 %v673_v58, %v3233_v11 }
 0x784   :  { %v679_v59 = vadd.f32 %v677_v57, %v3229_v3 }
 0x785   :  { %v688_v1 = vrot.slane %v686_v0, 6 }
 0x786   :  { %v2513_v60 = vmul.f32 -1.442695, %v679_v59 }
 0x788   :  { %2917 = vpow2.f32 %v2513_v60 }
 0x792   :  { %v2918_v61 = vpop.eup %2917 }
 0x793   :  { %v683_v62 = vadd.f32 1.0, %v2918_v61 }
 0x795   :  { %2919 = vrcp.f32 %v683_v62 }
 0x79f   :  { %v2920_v2 = vpop.eup %2919 }
 0x7a0   :  { %v690_v4 = vmul.f32 %v2920_v2, %v688_v1  ;;  %v693_v8 = vsub.f32 1.0, %v2920_v2  ;;  %v701_v13 = vmul.f32 %v2920_v2, %v699_v9 }
 0x7a2   :  { %v691_v5 = vadd.f32 %v690_v4, %v3238_v15 }
 0x7a4   :  { %2921 = vtanh.f32 %v691_v5 }
 0x7ae   :  { %v2922_v7 = vpop.eup %2921 }
 0x7af   :  { %695 = vrot.lane.b32.xlu1 %v2922_v7, %s3029_s26 }
 0x821   :  { %v696_v12 = vpop.permute.xlu1 %695 }
 0x822   :  { %v698_v14 = vmul.f32 %v696_v12, %v693_v8 }
 0x824   :  { %v3277_v16 = vadd.f32 %v701_v13, %v698_v14 }
 0x826   :  { %v709_v17 = vrot.slane %v3277_v16, 2  ;;  %v808_v37 = vrot.slane %v3277_v16, 7 }
 0x828   :  { %710 = vrot.lane.b32.xlu1 %v709_v17, %s3029_s26 }
 0x89a   :  { %v711_v19 = vpop.permute.xlu1 %710 }
 0x89b   :  { %2514 = vmatmul.mubr.msk.f32.vlgmr.msra.gmra.mrb[6].mxu1 %vm386_vm7, %v711_v19 }
 0x89c   :  { %2686 = vmatpush1.bf16.msra.mxu1 %v3104_v20  ;;  %996 = vmatprep.mubr.f32.mxu1 %v3027_v6 }
 0x89d   :  { %2688 = vmatprep.subr.bf16.mxu1 %v3120_v25 }
 0x8a0   :  { %2690 = vmatpush1.bf16.msra.mxu1 %v3122_v26 }
 0x8a1   :  { %2692 = vmatprep.subr.bf16.mxu1 %v3153_v42 }
 0x8a4   :  { %2694 = vmatpush1.bf16.msra.mxu1 %v3167_v47 }
 0x8a5   :  { %2696 = vmatprep.subr.bf16.mxu1 %v3177_v51 }
 0x8a8   :  { %2698 = vmatpush1.bf16.msra.mxu1 %v3185_v54 }
 0x8a9   :  { %2716 = vmatprep.subr.bf16.mxu1 %v3099_v18 }
 0x96e   :  { %v780_v21 = vpop.f32.mrb[6].mxu1 }
 0x96f   :  { %v786_v22 = vrot.slane %v780_v21, 5  ;;  %v782_v23 = vpop.f32.mrb[7].mxu1 }
 0x970   :  { %v795_v31 = vadd.f32 %v782_v23, %v3233_v11 }
 0x971   :  { %v788_v24 = vadd.f32 %v786_v22, %v3229_v3 }
 0x972   :  { %v797_v32 = vrot.slane %v795_v31, 5 }
 0x973   :  { %v2515_v27 = vmul.f32 -1.442695, %v788_v24 }
 0x975   :  { %2923 = vpow2.f32 %v2515_v27 }
 0x97f   :  { %v2924_v29 = vpop.eup %2923 }
 0x980   :  { %v792_v30 = vadd.f32 1.0, %v2924_v29 }
 0x982   :  { %2925 = vrcp.f32 %v792_v30 }
 0x98c   :  { %v2926_v33 = vpop.eup %2925 }
 0x98d   :  { %v799_v34 = vmul.f32 %v2926_v33, %v797_v32  ;;  %v802_v18 = vsub.f32 1.0, %v2926_v33  ;;  %v810_v40 = vmul.f32 %v2926_v33, %v808_v37 }
 0x98f   :  { %v800_v35 = vadd.f32 %v799_v34, %v3238_v15 }
 0x991   :  { %2927 = vtanh.f32 %v800_v35 }
 0x99b   :  { %v2928_v36 = vpop.eup %2927 }
 0x99c   :  { %804 = vrot.lane.b32.xlu1 %v2928_v36, %s3029_s26 }
 0xa0e   :  { %v805_v39 = vpop.permute.xlu1 %804 }
 0xa0f   :  { %v807_v41 = vmul.f32 %v805_v39, %v802_v18 }
 0xa11   :  { %v811_v43 = vadd.f32 %v810_v40, %v807_v41 }
 0xa13   :  { %v818_v44 = vrot.slane %v811_v43, 3  ;;  %v917_v1 = vrot.slane %v811_v43, 7 }
 0xa15   :  { %819 = vrot.lane.b32.xlu1 %v818_v44, %s3029_s26 }
 0xa87   :  { %v820_v45 = vpop.permute.xlu1 %819 }
 0xa88   :  { %2516 = vmatmul.mubr.msk.f32.vlgmr.msra.gmra.mrb[6].mxu0 %vm386_vm7, %v820_v45 }
 0xa89   :  { %2702 = vmatpush1.bf16.msra.mxu0 %v3104_v20  ;;  %1105 = vmatprep.mubr.f32.mxu0 %v3027_v6 }
 0xa8a   :  { %2704 = vmatprep.subr.bf16.mxu0 %v3120_v25 }
 0xa8d   :  { %2706 = vmatpush1.bf16.msra.mxu0 %v3122_v26 }
 0xa8e   :  { %2708 = vmatprep.subr.bf16.mxu0 %v3153_v42 }
 0xa91   :  { %2710 = vmatpush1.bf16.msra.mxu0 %v3167_v47 }
 0xa92   :  { %2712 = vmatprep.subr.bf16.mxu0 %v3177_v51 }
 0xa95   :  { %2714 = vmatpush1.bf16.msra.mxu0 %v3185_v54 }
 0xa96   :  { %2582 = vmatprep.subr.mxu0 %v3027_v6 }
 0xb5b   :  { %v889_v46 = vpop.f32.mrb[6].mxu0 }
 0xb5c   :  { %v895_v48 = vrot.slane %v889_v46, 4  ;;  %v891_v49 = vpop.f32.mrb[7].mxu0 }
 0xb5d   :  { %v904_v57 = vadd.f32 %v891_v49, %v3233_v11 }
 0xb5e   :  { %v897_v50 = vadd.f32 %v895_v48, %v3229_v3 }
 0xb5f   :  { %v906_v58 = vrot.slane %v904_v57, 4 }
 0xb60   :  { %v2517_v53 = vmul.f32 -1.442695, %v897_v50 }
 0xb62   :  { %2929 = vpow2.f32 %v2517_v53 }
 0xb6c   :  { %v2930_v55 = vpop.eup %2929 }
 0xb6d   :  { %v901_v56 = vadd.f32 1.0, %v2930_v55 }
 0xb6f   :  { %2931 = vrcp.f32 %v901_v56 }
 0xb79   :  { %v2932_v59 = vpop.eup %2931 }
 0xb7a   :  { %v908_v60 = vmul.f32 %v2932_v59, %v906_v58  ;;  %v911_v0 = vsub.f32 1.0, %v2932_v59  ;;  %v919_v4 = vmul.f32 %v2932_v59, %v917_v1 }
 0xb7c   :  { %v909_v61 = vadd.f32 %v908_v60, %v3238_v15 }
 0xb7e   :  { %2933 = vtanh.f32 %v909_v61 }
 0xb88   :  { %v2934_v62 = vpop.eup %2933 }
 0xb89   :  { %913 = vrot.lane.b32.xlu0 %v2934_v62, %s3029_s26 }
 0xb8d   :  { %595 = vrot.lane.b32.xlu0 %v3258_v52, %s3029_s26 }
 0xb91   :  { %813 = vrot.lane.b32.xlu0 %v811_v43, %s3029_s26 }
 0xbfb   :  { %v914_v2 = vpop.permute.xlu0 %913 }
 0xbfc   :  { %v916_v5 = vmul.f32 %v914_v2, %v911_v0 }
 0xbfe   :  { %v3314_v7 = vadd.f32 %v919_v4, %v916_v5 }
 0xbff   :  { %v596_v8 = vpop.permute.xlu0 %595 }
 0xc00   :  { %599 = vst.msk [vmem:[#allocation2] sm:$0x2] %vm598_vm8, %v596_v8  ;;  %v927_v9 = vrot.slane %v3314_v7, 4  ;;  %v1026_v24 = vrot.slane %v3314_v7, 7 }
 0xc02   :  { %928 = vrot.lane.b32.xlu1 %v927_v9, %s3029_s26 }
 0xc03   :  { %v814_v12 = vpop.permute.xlu0 %813 }
 0xc04   :  { %817 = vst.msk [vmem:[#allocation2] sm:$0x8] %vm816_vm9, %v814_v12 }
 0xc74   :  { %v929_v52 = vpop.permute.xlu1 %928 }
 0xc75   :  { %2518 = vmatmul.mubr.msk.f32.vlgmr.msra.gmra.mrb[8].mxu1 %vm386_vm7, %v929_v52 }
 0xc76   :  { %2718 = vmatpush1.bf16.msra.mxu1 %v3104_v20  ;;  %1214 = vmatprep.mubr.f32.mxu1 %v3027_v6 }
 0xc77   :  { %2720 = vmatprep.subr.bf16.mxu1 %v3120_v25 }
 0xc7a   :  { %2722 = vmatpush1.bf16.msra.mxu1 %v3122_v26 }
 0xc7b   :  { %2724 = vmatprep.subr.bf16.mxu1 %v3153_v42 }
 0xc7e   :  { %2726 = vmatpush1.bf16.msra.mxu1 %v3167_v47 }
 0xc7f   :  { %2728 = vmatprep.subr.bf16.mxu1 %v3177_v51 }
 0xc82   :  { %2730 = vmatpush1.bf16.msra.mxu1 %v3185_v54 }
 0xd48   :  { %v998_v13 = vpop.f32.mrb[8].mxu1 }
 0xd49   :  { %v1004_v14 = vrot.slane %v998_v13, 3  ;;  %v1000_v17 = vpop.f32.mrb[9].mxu1 }
 0xd4a   :  { %v1013_v25 = vadd.f32 %v1000_v17, %v3233_v11 }
 0xd4b   :  { %v1006_v19 = vadd.f32 %v1004_v14, %v3229_v3 }
 0xd4c   :  { %v1015_v26 = vrot.slane %v1013_v25, 3  ;;  %v1342_v25 = vld [vmem:[%s3729_s3 + $0x88] sm:$0xff] }
 0xd4d   :  { %v2519_v20 = vmul.f32 -1.442695, %v1006_v19 }
 0xd4f   :  { %2935 = vpow2.f32 %v2519_v20 }
 0xd59   :  { %v2936_v21 = vpop.eup %2935 }
 0xd5a   :  { %v1010_v22 = vadd.f32 1.0, %v2936_v21 }
 0xd5c   :  { %2937 = vrcp.f32 %v1010_v22 }
 0xd66   :  { %v2938_v42 = vpop.eup %2937 }
 0xd67   :  { %v1017_v23 = vmul.f32 %v2938_v42, %v1015_v26  ;;  %v1020_v54 = vsub.f32 1.0, %v2938_v42  ;;  %v1028_v29 = vmul.f32 %v2938_v42, %v1026_v24  ;;  %v1344_v26 = vld [vmem:[%s3729_s3 + $0x98] sm:$0xff]  ;;  %v1341_v42 = vld [vmem:[%s3729_s3 + $0x80] sm:$0xff] }
 0xd69   :  { %v1018_v47 = vadd.f32 %v1017_v23, %v3238_v15  ;;  %v1343_v23 = vld [vmem:[%s3729_s3 + $0x90] sm:$0xff] }
 0xd6a   :  { %v2733_v24 = vpack.c.bf16 %v1343_v23, %v1341_v42  ;;  %v1331_v42 = vld [vmem:[%s3729_s3 + $0x30] sm:$0xff] }
 0xd6b   :  { %2939 = vtanh.f32 %v1018_v47  ;;  %v1346_v47 = vld [vmem:[%s3729_s3 + $0xa8] sm:$0xff] }
 0xd75   :  { %v2940_v51 = vpop.eup %2939 }
 0xd76   :  { %1022 = vrot.lane.b32.xlu1 %v2940_v51, %s3029_s26  ;;  %v1348_v51 = vld [vmem:[%s3729_s3 + $0xb8] sm:$0xff] }
 0xde8   :  { %v1023_v27 = vpop.permute.xlu1 %1022 }
 0xde9   :  { %v1025_v30 = vmul.f32 %v1023_v27, %v1020_v54  ;;  %v2731_v54 = vpack.c.bf16 %v1344_v26, %v1342_v25  ;;  %v1329_v26 = vld [vmem:[%s3729_s3 + $0x20] sm:$0xff] }
 0xdeb   :  { %v1029_v31 = vadd.f32 %v1028_v29, %v1025_v30  ;;  %v2735_v29 = vpack.c.bf16 %v1348_v51, %v1346_v47  ;;  %v1345_v30 = vld [vmem:[%s3729_s3 + $0xa0] sm:$0xff]  ;;  %v1334_v47 = vld [vmem:[%s3729_s3 + $0x48] sm:$0xff]  ;;  %v1336_v51 = vld [vmem:[%s3729_s3 + $0x58] sm:$0xff] }
 0xded   :  { %1031 = vrot.lane.b32.xlu0 %v1029_v31, %s3029_s26  ;;  %v1036_v32 = vrot.slane %v1029_v31, 5  ;;  %v1135_v45 = vrot.slane %v1029_v31, 7  ;;  %v1347_v31 = vld [vmem:[%s3729_s3 + $0xb0] sm:$0xff] }
 0xdef   :  { %1037 = vrot.lane.b32.xlu1 %v1036_v32, %s3029_s26  ;;  %v1350_v32 = vld [vmem:[%s3729_s3 + $0xc8] sm:$0xff] }
 0xe5f   :  { %v1032_v33 = vpop.permute.xlu0 %1031 }
 0xe60   :  { %1035 = vst.msk [vmem:[#allocation2] sm:$0x20] %vm1034_vm10, %v1032_v33  ;;  %v1352_v33 = vld [vmem:[%s3729_s3 + $0xd8] sm:$0xff] }
 0xe61   :  { %v1038_v34 = vpop.permute.xlu1 %1037 }
 0xe62   :  { %2520 = vmatmul.mubr.msk.f32.vlgmr.msra.gmra.mrb[8].mxu0 %vm386_vm7, %v1038_v34  ;;  %v2737_v34 = vpack.c.bf16 %v1347_v31, %v1345_v30  ;;  %v1333_v30 = vld [vmem:[%s3729_s3 + $0x40] sm:$0xff]  ;;  %v1335_v31 = vld [vmem:[%s3729_s3 + $0x50] sm:$0xff] }
 0xe63   :  { %2584 = vmatprep.mubr.msk.f32.mxu0 %vm3028_vm0, %v3027_v6 }
 0xf35   :  { %v1107_v35 = vpop.f32.mrb[8].mxu0 }
 0xf36   :  { %v1113_v36 = vrot.slane %v1107_v35, 2  ;;  %v1109_v18 = vpop.f32.mrb[9].mxu0  ;;  %v2739_v35 = vpack.c.bf16 %v1352_v33, %v1350_v32  ;;  %v1338_v32 = vld [vmem:[%s3729_s3 + $0x68] sm:$0xff]  ;;  %v1340_v33 = vld [vmem:[%s3729_s3 + $0x78] sm:$0xff] }
 0xf37   :  { %v1122_v43 = vadd.f32 %v1109_v18, %v3233_v11  ;;  %v1351_v18 = vld [vmem:[%s3729_s3 + $0xd0] sm:$0xff] }
 0xf38   :  { %v1115_v37 = vadd.f32 %v1113_v36, %v3229_v3  ;;  %v1349_v36 = vld [vmem:[%s3729_s3 + $0xc0] sm:$0xff] }
 0xf39   :  { %v1124_v44 = vrot.slane %v1122_v43, 2  ;;  %v1353_v43 = vld [vmem:[%s3729_s3 + $0xe0] sm:$0xff] }
 0xf3a   :  { %v2521_v39 = vmul.f32 -1.442695, %v1115_v37  ;;  %v1354_v37 = vld [vmem:[%s3729_s3 + $0xe8] sm:$0xff] }
 0xf3c   :  { %2941 = vpow2.f32 %v2521_v39  ;;  %v1356_v39 = vld [vmem:[%s3729_s3 + $0xf8] sm:$0xff] }
 0xf46   :  { %v2942_v40 = vpop.eup %2941 }
 0xf47   :  { %v1119_v41 = vadd.f32 1.0, %v2942_v40  ;;  %v2741_v40 = vpack.c.bf16 %v1351_v18, %v1349_v36  ;;  %v1337_v36 = vld [vmem:[%s3729_s3 + $0x60] sm:$0xff]  ;;  %v1339_v18 = vld [vmem:[%s3729_s3 + $0x70] sm:$0xff] }
 0xf49   :  { %2943 = vrcp.f32 %v1119_v41  ;;  %v2743_v41 = vpack.c.bf16 %v1356_v39, %v1354_v37  ;;  %v2761_v37 = vpack.c.bf16 %v1339_v18, %v1337_v36 }
 0xf53   :  { %v2944_v46 = vpop.eup %2943 }
 0xf54   :  { %v1126_v48 = vmul.f32 %v2944_v46, %v1124_v44  ;;  %v1137_v49 = vmul.f32 %v2944_v46, %v1135_v45  ;;  %v1129_v55 = vsub.f32 1.0, %v2944_v46  ;;  %v1355_v44 = vld [vmem:[%s3729_s3 + $0xf0] sm:$0xff]  ;;  %v1326_v46 = vld [vmem:[%s3729_s3 + $0x8] sm:$0xff] }
 0xf55   :  { %v2745_v45 = vpack.c.bf16 %v1355_v44, %v1353_v43 }
 0xf56   :  { %v1127_v50 = vadd.f32 %v1126_v48, %v3238_v15  ;;  %v1328_v48 = vld [vmem:[%s3729_s3 + $0x18] sm:$0xff] }
 0xf58   :  { %2945 = vtanh.f32 %v1127_v50  ;;  %v2529_v50 = vld [vmem:[%s3730_s4 + $0x88] sm:$0xff] }
 0xf62   :  { %v2946_v53 = vpop.eup %2945 }
 0xf63   :  { %1131 = vrot.lane.b32.xlu1 %v2946_v53, %s3029_s26  ;;  %v2531_v53 = vld [vmem:[%s3730_s4 + $0x98] sm:$0xff] }
 0xfd5   :  { %v1132_v56 = vpop.permute.xlu1 %1131 }
 0xfd6   :  { %v1134_v57 = vmul.f32 %v1132_v56, %v1129_v55  ;;  %v3430_v55 = vpack.c.bf16 %v2531_v53, %v2529_v50  ;;  %v2528_v56 = vld [vmem:[%s3730_s4 + $0x80] sm:$0xff] }
 0xfd8   :  { %v1138_v58 = vadd.f32 %v1137_v49, %v1134_v57  ;;  %v2747_v49 = vpack.c.bf16 %v1328_v48, %v1326_v46  ;;  %v2530_v57 = vld [vmem:[%s3730_s4 + $0x90] sm:$0xff]  ;;  %2764 = vmatprep.subr.bf16.mxu1 %v3430_v55 }
 0xfda   :  { %v1145_v59 = vrot.slane %v1138_v58, 6  ;;  %v1244_v17 = vrot.slane %v1138_v58, 7 }
 0xfdc   :  { %1146 = vrot.lane.b32.xlu1 %v1145_v59, %s3029_s26  ;;  %v2533_v59 = vld [vmem:[%s3730_s4 + $0xa8] sm:$0xff] }
0x104e   :  { %v1147_v60 = vpop.permute.xlu1 %1146 }
0x104f   :  { %2522 = vmatmul.mubr.msk.f32.vlgmr.msra.gmra.mrb[10].mxu1 %vm386_vm7, %v1147_v60  ;;  %v2535_v60 = vld [vmem:[%s3730_s4 + $0xb8] sm:$0xff] }
0x1050   :  { %1602 = vmatprep.mubr.f32.mxu1 %v3027_v6 }
0x1122   :  { %v1216_v61 = vpop.f32.mrb[10].mxu1 }
0x1123   :  { %v1222_v62 = vrot.slane %v1216_v61, 1  ;;  %v1218_v0 = vpop.f32.mrb[11].mxu1  ;;  %v2532_v61 = vld [vmem:[%s3730_s4 + $0xa0] sm:$0xff] }
0x1124   :  { %v1231_v8 = vadd.f32 %v1218_v0, %v3233_v11  ;;  %v3454_v0 = vpack.c.bf16 %v2535_v60, %v2533_v59 }
0x1125   :  { %v1224_v1 = vadd.f32 %v1222_v62, %v3229_v3  ;;  %v2534_v62 = vld [vmem:[%s3730_s4 + $0xb0] sm:$0xff] }
0x1126   :  { %v1233_v9 = vrot.slane %v1231_v8, 1  ;;  %v2538_v8 = vld [vmem:[%s3730_s4 + $0xd0] sm:$0xff] }
0x1127   :  { %v2523_v2 = vmul.f32 -1.442695, %v1224_v1  ;;  %v3456_v1 = vpack.c.bf16 %v2534_v62, %v2532_v61 }
0x1129   :  { %2947 = vpow2.f32 %v2523_v2  ;;  %v2537_v2 = vld [vmem:[%s3730_s4 + $0xc8] sm:$0xff] }
0x1133   :  { %v2948_v4 = vpop.eup %2947 }
0x1134   :  { %v1228_v5 = vadd.f32 1.0, %v2948_v4  ;;  %v2539_v4 = vld [vmem:[%s3730_s4 + $0xd8] sm:$0xff] }
0x1136   :  { %2949 = vrcp.f32 %v1228_v5  ;;  %v2536_v5 = vld [vmem:[%s3730_s4 + $0xc0] sm:$0xff] }
0x1140   :  { %v2950_v12 = vpop.eup %2949 }
0x1141   :  { %v1235_v52 = vmul.f32 %v2950_v12, %v1233_v9  ;;  %v1238_v3 = vsub.f32 1.0, %v2950_v12  ;;  %v1246_v19 = vmul.f32 %v2950_v12, %v1244_v17  ;;  %v3472_v9 = vpack.c.bf16 %v2539_v4, %v2537_v2 }
0x1142   :  { %v3474_v12 = vpack.c.bf16 %v2538_v8, %v2536_v5 }
0x1143   :  { %v1236_v13 = vadd.f32 %v1235_v52, %v3238_v15  ;;  %v2541_v52 = vld [vmem:[%s3730_s4 + $0xe8] sm:$0xff] }
0x1145   :  { %2951 = vtanh.f32 %v1236_v13  ;;  %v2543_v13 = vld [vmem:[%s3730_s4 + $0xf8] sm:$0xff] }
0x1146   :  { %v3490_v17 = vpack.c.bf16 %v2543_v13, %v2541_v52 }
0x114f   :  { %v2952_v14 = vpop.eup %2951 }
0x1150   :  { %1240 = vrot.lane.b32.xlu1 %v2952_v14, %s3029_s26  ;;  %v2540_v14 = vld [vmem:[%s3730_s4 + $0xe0] sm:$0xff] }
0x1154   :  { %704 = vrot.lane.b32.xlu1 %v3277_v16, %s3029_s26 }
0x1158   :  { %922 = vrot.lane.b32.xlu1 %v3314_v7, %s3029_s26 }
0x115c   :  { %1140 = vrot.lane.b32.xlu1 %v1138_v58, %s3029_s26  ;;  %v3438_v58 = vpack.c.bf16 %v2530_v57, %v2528_v56 }
0x115e   :  { %2766 = vmatpush1.bf16.msra.mxu1 %v3438_v58 }
0x115f   :  { %2768 = vmatprep.subr.bf16.mxu1 %v3454_v0 }
0x1162   :  { %2770 = vmatpush1.bf16.msra.mxu1 %v3456_v1 }
0x1163   :  { %2772 = vmatprep.subr.bf16.mxu1 %v3472_v9 }
0x1166   :  { %2774 = vmatpush1.bf16.msra.mxu1 %v3474_v12 }
0x1167   :  { %2776 = vmatprep.subr.bf16.mxu1 %v3490_v17 }
0x11c2   :  { %v1241_v11 = vpop.permute.xlu1 %1240 }
0x11c3   :  { %v1243_v20 = vmul.f32 %v1241_v11, %v1238_v3  ;;  %v2542_v3 = vld [vmem:[%s3730_s4 + $0xf0] sm:$0xff] }
0x11c4   :  { %v3492_v11 = vpack.c.bf16 %v2542_v3, %v2540_v14 }
0x11c5   :  { %v3356_v21 = vadd.f32 %v1246_v19, %v1243_v20  ;;  %v2545_v19 = vld [vmem:[%s3731_s5 + $0x3] ss:$0 sm:$0xff] }
0x11c6   :  { %v705_v15 = vpop.permute.xlu1 %704  ;;  %2778 = vmatpush1.bf16.msra.mxu1 %v3492_v11  ;;  %1621 = vrot.lane.b32.xlu1 %v2545_v19, %s3029_s26  ;;  %v1325_v20 = vld [vmem:[%s3729_s3] sm:$0xff] }
0x11c7   :  { %708 = vst.msk [vmem:[#allocation2] sm:$0x4] %vm707_vm11, %v705_v15  ;;  %1249 = vrot.lane.b32.xlu0 %v3356_v21, %s3029_s26  ;;  %2780 = vmatprep.subr.bf16.mxu1 %v3430_v55  ;;  %v1327_v15 = vld [vmem:[%s3729_s3 + $0x10] sm:$0xff] }
0x11c9   :  { %1603 = vmatmul.mubr.f32.vlgmr.msra.gmra.mrb[12].mxu1 %v3027_v6 }
0x11ca   :  { %v923_v16 = vpop.permute.xlu1 %922  ;;  %2782 = vmatpush1.bf16.msra.mxu1 %v3438_v58  ;;  %1707 = vmatprep.mubr.f32.mxu1 %v3027_v6 }
0x11cb   :  { %926 = vst.msk [vmem:[#allocation2] sm:$0x10] %vm925_vm12, %v923_v16  ;;  %2784 = vmatprep.subr.bf16.mxu1 %v3454_v0  ;;  %v1330_v16 = vld [vmem:[%s3729_s3 + $0x28] sm:$0xff] }
0x11ce   :  { %v1141_v7 = vpop.permute.xlu1 %1140  ;;  %2786 = vmatpush1.bf16.msra.mxu1 %v3456_v1 }
0x11cf   :  { %1144 = vst.msk [vmem:[#allocation2] sm:$0x40] %vm1143_vm13, %v1141_v7  ;;  %2788 = vmatprep.subr.bf16.mxu1 %v3472_v9  ;;  %v1332_v7 = vld [vmem:[%s3729_s3 + $0x38] sm:$0xff] }
0x11d0   :  { %v2751_v25 = vpack.c.bf16 %v1332_v7, %v1330_v16 }
0x11d2   :  { %2790 = vmatpush1.bf16.msra.mxu1 %v3474_v12 }
0x11d3   :  { %2792 = vmatprep.subr.bf16.mxu1 %v3490_v17 }
0x11d6   :  { %2794 = vmatpush1.bf16.msra.mxu1 %v3492_v11 }
0x11d7   :  { %2812 = vmatprep.subr.bf16.mxu1 %v3430_v55 }
0x1238   :  { %v3575_v53 = vpop.permute.xlu1 %1621 }
0x1239   :  { %v1250_v22 = vpop.permute.xlu0 %1249 }
0x123a   :  { %1253 = vst.msk [vmem:[#allocation2] sm:$0x80] %vm1252_vm14, %v1250_v22  ;;  %v2749_v22 = vpack.c.bf16 %v1327_v15, %v1325_v20 }
0x1241   :  { %v3382_v27 = vld [vmem:[#allocation2] sm:$0xff] }
0x1242   :  { %2583 = vmatpush3.msra.mxu0 %v3382_v27 }
0x1243   :  { %2585 = vmatmul.mubr.msk.f32.vlgmr.msra.gmra.mrb[10].mxu0 %vm125_vm5, %v3142_v38  ;;  %2732 = vmatprep.subr.bf16.mxu0 %v2731_v54 }
0x1244   :  { %2734 = vmatpush1.bf16.msra.mxu0 %v2733_v24  ;;  %1424 = vmatprep.mubr.f32.mxu0 %v3027_v6  ;;  %v2753_v24 = vpack.c.bf16 %v1331_v42, %v1329_v26 }
0x1245   :  { %2736 = vmatprep.subr.bf16.mxu0 %v2735_v29  ;;  %v2755_v29 = vpack.c.bf16 %v1336_v51, %v1334_v47 }
0x1248   :  { %2738 = vmatpush1.bf16.msra.mxu0 %v2737_v34  ;;  %v2757_v34 = vpack.c.bf16 %v1335_v31, %v1333_v30 }
0x1249   :  { %2740 = vmatprep.subr.bf16.mxu0 %v2739_v35  ;;  %v2759_v35 = vpack.c.bf16 %v1340_v33, %v1338_v32 }
0x124c   :  { %2742 = vmatpush1.bf16.msra.mxu0 %v2741_v40  ;;  %v2527_v40 = vld [vmem:[%s3731_s5 + $0x1] ss:$2 sm:$0x3] }
0x124d   :  { %2744 = vmatprep.subr.bf16.mxu0 %v2743_v41  ;;  %v1511_v41 = vrot.slane %v2527_v40, %v359_v63  ;;  %v1515_v56 = vrot.slane %v2527_v40, %v363_v10 }
0x1250   :  { %2746 = vmatpush1.bf16.msra.mxu0 %v2745_v45 }
0x1251   :  { %2748 = vmatprep.subr.bf16.mxu0 %v2747_v49 }
0x129c   :  { %v1604_v39 = vpop.f32.mrb[12].mxu1 }
0x1316   :  { %v1321_v23 = vpop.f32.mrb[10].mxu0 }
0x1317   :  { %v2586_v54 = vpop.f32.mrb[11].mxu0  ;;  %2525 = vmatmul.mubr.msk.f32.vlgmr.msra.gmra.mrb[12].mxu0 %vm386_vm7, %v1321_v23 }
0x1318   :  { %2750 = vmatpush1.bf16.msra.mxu0 %v2749_v22  ;;  %1498 = vmatprep.mubr.f32.mxu0 %v3027_v6 }
0x1319   :  { %2752 = vmatprep.subr.bf16.mxu0 %v2751_v25 }
0x131c   :  { %2754 = vmatpush1.bf16.msra.mxu0 %v2753_v24 }
0x131d   :  { %2756 = vmatprep.subr.bf16.mxu0 %v2755_v29 }
0x1320   :  { %2758 = vmatpush1.bf16.msra.mxu0 %v2757_v34 }
0x1321   :  { %2760 = vmatprep.subr.bf16.mxu0 %v2759_v35 }
0x1324   :  { %2762 = vmatpush1.bf16.msra.mxu0 %v2761_v37 }
0x1325   :  { %2796 = vmatprep.subr.bf16.mxu0 %v3430_v55 }
0x1327   :  { %2526 = vmatmul.mubr.msk.f32.vlgmr.msra.gmra.mrb[12].mxu0 %vm386_vm7, %v3382_v27  ;;  %v1606_v27 = vpop.f32.mrb[13].mxu1 }
0x1328   :  { %2798 = vmatpush1.bf16.msra.mxu0 %v3438_v58  ;;  %1815 = vmatprep.mubr.f32.mxu0 %v3027_v6  ;;  %v1624_v57 = vadd.f32 %v3575_v53, %v1606_v27 }
0x1329   :  { %2800 = vmatprep.subr.bf16.mxu0 %v3454_v0 }
0x132c   :  { %2802 = vmatpush1.bf16.msra.mxu0 %v3456_v1 }
0x132d   :  { %2804 = vmatprep.subr.bf16.mxu0 %v3472_v9 }
0x1330   :  { %2806 = vmatpush1.bf16.msra.mxu0 %v3474_v12 }
0x1331   :  { %2808 = vmatprep.subr.bf16.mxu0 %v3490_v17 }
0x1334   :  { %2810 = vmatpush1.bf16.msra.mxu0 %v3492_v11 }
0x1335   :  { %2828 = vmatprep.subr.bf16.mxu0 %v3430_v55 }
0x13fa   :  { %v1500_v43 = vpop.f32.mrb[12].mxu0 }
0x13fb   :  { %v3572_v44 = vadd.f32 %v1511_v41, %v1500_v43  ;;  %v1502_v45 = vpop.f32.mrb[13].mxu0 }
0x13fc   :  { %v3580_v63 = vadd.f32 %v1515_v56, %v1502_v45 }
0x13fd   :  { %v1609_v46 = vadd.f32 %v1604_v39, %v3572_v44 }
0x13ff   :  { %v2544_v48 = vmul.f32 -1.442695, %v1609_v46 }
0x1401   :  { %2953 = vpow2.f32 %v2544_v48 }
0x140b   :  { %v2954_v49 = vpop.eup %2953 }
0x140c   :  { %v1613_v50 = vadd.f32 1.0, %v2954_v49 }
0x140e   :  { %2955 = vrcp.f32 %v1613_v50 }
0x1418   :  { %v2956_v59 = vpop.eup %2955 }
0x1419   :  { %v1625_v60 = vmul.f32 %v2956_v59, %v1624_v57  ;;  %v1628_v2 = vsub.f32 1.0, %v2956_v59  ;;  %v1634_v5 = vmul.f32 0.0, %v2956_v59 }
0x141b   :  { %v1626_v61 = vadd.f32 %v1625_v60, %v3580_v63 }
0x141d   :  { %2957 = vtanh.f32 %v1626_v61 }
0x1427   :  { %v2958_v62 = vpop.eup %2957 }
0x1428   :  { %1630 = vrot.lane.b32.xlu0 %v2958_v62, %s3029_s26 }
0x149a   :  { %v1631_v4 = vpop.permute.xlu0 %1630 }
0x149b   :  { %v1633_v8 = vmul.f32 %v1631_v4, %v1628_v2 }
0x149d   :  { %v1635_v52 = vadd.f32 %v1634_v5, %v1633_v8 }
0x149f   :  { %1637 = vrot.lane.b32.xlu1 %v1635_v52, %s3029_s26  ;;  %v1737_v7 = vrot.slane %v1635_v52, 7 }
0x1511   :  { %v1638_v28 = vpop.permute.xlu1 %1637 }
0x1512   :  { %1640 = vst.msk [vmem:[#allocation3] sm:$0x1] %vm492_vm6, %v1638_v28  ;;  %2546 = vmatmul.mubr.msk.f32.vlgmr.msra.gmra.mrb[14].mxu1 %vm386_vm7, %v1638_v28 }
0x1513   :  { %2814 = vmatpush1.bf16.msra.mxu1 %v3438_v58  ;;  %1923 = vmatprep.mubr.f32.mxu1 %v3027_v6 }
0x1514   :  { %2816 = vmatprep.subr.bf16.mxu1 %v3454_v0 }
0x1517   :  { %2818 = vmatpush1.bf16.msra.mxu1 %v3456_v1 }
0x1518   :  { %2820 = vmatprep.subr.bf16.mxu1 %v3472_v9 }
0x151b   :  { %2822 = vmatpush1.bf16.msra.mxu1 %v3474_v12 }
0x151c   :  { %2824 = vmatprep.subr.bf16.mxu1 %v3490_v17 }
0x151f   :  { %2826 = vmatpush1.bf16.msra.mxu1 %v3492_v11 }
0x1520   :  { %2844 = vmatprep.subr.bf16.mxu1 %v3430_v55 }
0x15e5   :  { %v1709_v10 = vpop.f32.mrb[14].mxu1 }
0x15e6   :  { %v1715_v13 = vrot.slane %v1709_v10, 7  ;;  %v1711_v14 = vpop.f32.mrb[15].mxu1 }
0x15e7   :  { %v1724_v16 = vadd.f32 %v1711_v14, %v3575_v53 }
0x15e8   :  { %v1717_v3 = vadd.f32 %v1715_v13, %v3572_v44 }
0x15e9   :  { %v1726_v22 = vrot.slane %v1724_v16, 7 }
0x15ea   :  { %v2547_v19 = vmul.f32 -1.442695, %v1717_v3 }
0x15ec   :  { %2959 = vpow2.f32 %v2547_v19 }
0x15f6   :  { %v2960_v20 = vpop.eup %2959 }
0x15f7   :  { %v1721_v15 = vadd.f32 1.0, %v2960_v20 }
0x15f9   :  { %2961 = vrcp.f32 %v1721_v15 }
0x1603   :  { %v2962_v25 = vpop.eup %2961 }
0x1604   :  { %v1728_v26 = vmul.f32 %v2962_v25, %v1726_v22  ;;  %v1739_v42 = vmul.f32 %v2962_v25, %v1737_v7  ;;  %v1731_v51 = vsub.f32 1.0, %v2962_v25 }
0x1606   :  { %v1729_v23 = vadd.f32 %v1728_v26, %v3580_v63 }
0x1608   :  { %2963 = vtanh.f32 %v1729_v23 }
0x1612   :  { %v2964_v47 = vpop.eup %2963 }
0x1613   :  { %1733 = vrot.lane.b32.xlu0 %v2964_v47, %s3029_s26 }
0x1685   :  { %v1734_v54 = vpop.permute.xlu0 %1733 }
0x1686   :  { %v1736_v24 = vmul.f32 %v1734_v54, %v1731_v51 }
0x1688   :  { %v3600_v29 = vadd.f32 %v1739_v42, %v1736_v24 }
0x168a   :  { %v1746_v30 = vrot.slane %v3600_v29, 1  ;;  %v1845_v48 = vrot.slane %v3600_v29, 7 }
0x168c   :  { %1747 = vrot.lane.b32.xlu1 %v1746_v30, %s3029_s26 }
0x16fe   :  { %v1748_v31 = vpop.permute.xlu1 %1747 }
0x16ff   :  { %2548 = vmatmul.mubr.msk.f32.vlgmr.msra.gmra.mrb[14].mxu0 %vm386_vm7, %v1748_v31 }
0x1700   :  { %2830 = vmatpush1.bf16.msra.mxu0 %v3438_v58  ;;  %2031 = vmatprep.mubr.f32.mxu0 %v3027_v6 }
0x1701   :  { %2832 = vmatprep.subr.bf16.mxu0 %v3454_v0 }
0x1704   :  { %2834 = vmatpush1.bf16.msra.mxu0 %v3456_v1 }
0x1705   :  { %2836 = vmatprep.subr.bf16.mxu0 %v3472_v9 }
0x1708   :  { %2838 = vmatpush1.bf16.msra.mxu0 %v3474_v12 }
0x1709   :  { %2840 = vmatprep.subr.bf16.mxu0 %v3490_v17 }
0x170c   :  { %2842 = vmatpush1.bf16.msra.mxu0 %v3492_v11 }
0x170d   :  { %2860 = vmatprep.subr.bf16.mxu0 %v3430_v55 }
0x17d2   :  { %v1817_v32 = vpop.f32.mrb[14].mxu0 }
0x17d3   :  { %v1823_v33 = vrot.slane %v1817_v32, 6  ;;  %v1819_v34 = vpop.f32.mrb[15].mxu0 }
0x17d4   :  { %v1832_v39 = vadd.f32 %v1819_v34, %v3575_v53 }
0x17d5   :  { %v1825_v35 = vadd.f32 %v1823_v33, %v3572_v44 }
0x17d6   :  { %v1834_v27 = vrot.slane %v1832_v39, 6 }
0x17d7   :  { %v2549_v36 = vmul.f32 -1.442695, %v1825_v35 }
0x17d9   :  { %2965 = vpow2.f32 %v2549_v36 }
0x17e3   :  { %v2966_v18 = vpop.eup %2965 }
0x17e4   :  { %v1829_v37 = vadd.f32 1.0, %v2966_v18 }
0x17e6   :  { %2967 = vrcp.f32 %v1829_v37 }
0x17f0   :  { %v2968_v40 = vpop.eup %2967 }
0x17f1   :  { %v1836_v41 = vmul.f32 %v2968_v40, %v1834_v27  ;;  %v1839_v46 = vsub.f32 1.0, %v2968_v40  ;;  %v1847_v50 = vmul.f32 %v2968_v40, %v1845_v48 }
0x17f3   :  { %v1837_v43 = vadd.f32 %v1836_v41, %v3580_v63 }
0x17f5   :  { %2969 = vtanh.f32 %v1837_v43 }
0x17ff   :  { %v2970_v45 = vpop.eup %2969 }
0x1800   :  { %1841 = vrot.lane.b32.xlu0 %v2970_v45, %s3029_s26 }
0x1872   :  { %v1842_v49 = vpop.permute.xlu0 %1841 }
0x1873   :  { %v1844_v56 = vmul.f32 %v1842_v49, %v1839_v46 }
0x1875   :  { %v3619_v57 = vadd.f32 %v1847_v50, %v1844_v56 }
0x1877   :  { %v1854_v59 = vrot.slane %v3619_v57, 2  ;;  %v1953_v20 = vrot.slane %v3619_v57, 7 }
0x1879   :  { %1855 = vrot.lane.b32.xlu1 %v1854_v59, %s3029_s26 }
0x18eb   :  { %v1856_v60 = vpop.permute.xlu1 %1855 }
0x18ec   :  { %2550 = vmatmul.mubr.msk.f32.vlgmr.msra.gmra.mrb[16].mxu1 %vm386_vm7, %v1856_v60 }
0x18ed   :  { %2846 = vmatpush1.bf16.msra.mxu1 %v3438_v58  ;;  %2139 = vmatprep.mubr.f32.mxu1 %v3027_v6 }
0x18ee   :  { %2848 = vmatprep.subr.bf16.mxu1 %v3454_v0 }
0x18f1   :  { %2850 = vmatpush1.bf16.msra.mxu1 %v3456_v1 }
0x18f2   :  { %2852 = vmatprep.subr.bf16.mxu1 %v3472_v9 }
0x18f5   :  { %2854 = vmatpush1.bf16.msra.mxu1 %v3474_v12 }
0x18f6   :  { %2856 = vmatprep.subr.bf16.mxu1 %v3490_v17 }
0x18f9   :  { %2858 = vmatpush1.bf16.msra.mxu1 %v3492_v11 }
0x18fa   :  { %2876 = vmatprep.subr.bf16.mxu1 %v3430_v55 }
0x19bf   :  { %v1925_v61 = vpop.f32.mrb[16].mxu1 }
0x19c0   :  { %v1931_v62 = vrot.slane %v1925_v61, 5  ;;  %v1927_v2 = vpop.f32.mrb[17].mxu1 }
0x19c1   :  { %v1940_v28 = vadd.f32 %v1927_v2, %v3575_v53 }
0x19c2   :  { %v1933_v4 = vadd.f32 %v1931_v62, %v3572_v44 }
0x19c3   :  { %v1942_v10 = vrot.slane %v1940_v28, 5 }
0x19c4   :  { %v2551_v5 = vmul.f32 -1.442695, %v1933_v4 }
0x19c6   :  { %2971 = vpow2.f32 %v2551_v5 }
0x19d0   :  { %v2972_v8 = vpop.eup %2971 }
0x19d1   :  { %v1937_v52 = vadd.f32 1.0, %v2972_v8 }
0x19d3   :  { %2973 = vrcp.f32 %v1937_v52 }
0x19dd   :  { %v2974_v13 = vpop.eup %2973 }
0x19de   :  { %v1944_v14 = vmul.f32 %v2974_v13, %v1942_v10  ;;  %v1947_v55 = vsub.f32 1.0, %v2974_v13  ;;  %v1955_v16 = vmul.f32 %v2974_v13, %v1953_v20 }
0x19e0   :  { %v1945_v3 = vadd.f32 %v1944_v14, %v3580_v63 }
0x19e2   :  { %2975 = vtanh.f32 %v1945_v3 }
0x19ec   :  { %v2976_v19 = vpop.eup %2975 }
0x19ed   :  { %1949 = vrot.lane.b32.xlu0 %v2976_v19, %s3029_s26 }
0x1a5f   :  { %v1950_v15 = vpop.permute.xlu0 %1949 }
0x1a60   :  { %v1952_v7 = vmul.f32 %v1950_v15, %v1947_v55 }
0x1a62   :  { %v3638_v22 = vadd.f32 %v1955_v16, %v1952_v7 }
0x1a64   :  { %v1962_v25 = vrot.slane %v3638_v22, 3  ;;  %v2061_v37 = vrot.slane %v3638_v22, 7 }
0x1a66   :  { %1963 = vrot.lane.b32.xlu1 %v1962_v25, %s3029_s26 }
0x1ad8   :  { %v1964_v26 = vpop.permute.xlu1 %1963 }
0x1ad9   :  { %2552 = vmatmul.mubr.msk.f32.vlgmr.msra.gmra.mrb[16].mxu0 %vm386_vm7, %v1964_v26 }
0x1ada   :  { %2862 = vmatpush1.bf16.msra.mxu0 %v3438_v58  ;;  %2247 = vmatprep.mubr.f32.mxu0 %v3027_v6 }
0x1adb   :  { %2864 = vmatprep.subr.bf16.mxu0 %v3454_v0 }
0x1ade   :  { %2866 = vmatpush1.bf16.msra.mxu0 %v3456_v1 }
0x1adf   :  { %2868 = vmatprep.subr.bf16.mxu0 %v3472_v9 }
0x1ae2   :  { %2870 = vmatpush1.bf16.msra.mxu0 %v3474_v12 }
0x1ae3   :  { %2872 = vmatprep.subr.bf16.mxu0 %v3490_v17 }
0x1ae6   :  { %2874 = vmatpush1.bf16.msra.mxu0 %v3492_v11 }
0x1ae7   :  { %2587 = vmatprep.subr.mxu0 %v3027_v6 }
0x1bac   :  { %v2033_v42 = vpop.f32.mrb[16].mxu0 }
0x1bad   :  { %v2039_v23 = vrot.slane %v2033_v42, 4  ;;  %v2035_v47 = vpop.f32.mrb[17].mxu0 }
0x1bae   :  { %v2048_v31 = vadd.f32 %v2035_v47, %v3575_v53 }
0x1baf   :  { %v2041_v51 = vadd.f32 %v2039_v23, %v3572_v44 }
0x1bb0   :  { %v2050_v32 = vrot.slane %v2048_v31, 4 }
0x1bb1   :  { %v2553_v54 = vmul.f32 -1.442695, %v2041_v51 }
0x1bb3   :  { %2977 = vpow2.f32 %v2553_v54 }
0x1bbd   :  { %v2978_v24 = vpop.eup %2977 }
0x1bbe   :  { %v2045_v30 = vadd.f32 1.0, %v2978_v24 }
0x1bc0   :  { %2979 = vrcp.f32 %v2045_v30 }
0x1bca   :  { %v2980_v33 = vpop.eup %2979 }
0x1bcb   :  { %v2052_v34 = vmul.f32 %v2980_v33, %v2050_v32  ;;  %v2055_v18 = vsub.f32 1.0, %v2980_v33  ;;  %v2063_v27 = vmul.f32 %v2980_v33, %v2061_v37 }
0x1bcd   :  { %v2053_v35 = vadd.f32 %v2052_v34, %v3580_v63 }
0x1bcf   :  { %2981 = vtanh.f32 %v2053_v35 }
0x1bd9   :  { %v2982_v36 = vpop.eup %2981 }
0x1bda   :  { %2057 = vrot.lane.b32.xlu0 %v2982_v36, %s3029_s26 }
0x1c4c   :  { %v2058_v39 = vpop.permute.xlu0 %2057 }
0x1c4d   :  { %v2060_v40 = vmul.f32 %v2058_v39, %v2055_v18 }
0x1c4f   :  { %v3657_v41 = vadd.f32 %v2063_v27, %v2060_v40 }
0x1c51   :  { %v2070_v43 = vrot.slane %v3657_v41, 4  ;;  %v2169_v61 = vrot.slane %v3657_v41, 7 }
0x1c53   :  { %2071 = vrot.lane.b32.xlu1 %v2070_v43, %s3029_s26 }
0x1cc5   :  { %v2072_v45 = vpop.permute.xlu1 %2071 }
0x1cc6   :  { %2554 = vmatmul.mubr.msk.f32.vlgmr.msra.gmra.mrb[18].mxu1 %vm386_vm7, %v2072_v45 }
0x1cc7   :  { %2878 = vmatpush1.bf16.msra.mxu1 %v3438_v58  ;;  %2355 = vmatprep.mubr.f32.mxu1 %v3027_v6 }
0x1cc8   :  { %2880 = vmatprep.subr.bf16.mxu1 %v3454_v0 }
0x1ccb   :  { %2882 = vmatpush1.bf16.msra.mxu1 %v3456_v1 }
0x1ccc   :  { %2884 = vmatprep.subr.bf16.mxu1 %v3472_v9 }
0x1ccf   :  { %2886 = vmatpush1.bf16.msra.mxu1 %v3474_v12 }
0x1cd0   :  { %2888 = vmatprep.subr.bf16.mxu1 %v3490_v17 }
0x1cd3   :  { %2890 = vmatpush1.bf16.msra.mxu1 %v3492_v11 }
0x1d99   :  { %v2141_v46 = vpop.f32.mrb[18].mxu1 }
0x1d9a   :  { %v2147_v48 = vrot.slane %v2141_v46, 3  ;;  %v2143_v49 = vpop.f32.mrb[19].mxu1 }
0x1d9b   :  { %v2156_v0 = vadd.f32 %v2143_v49, %v3575_v53 }
0x1d9c   :  { %v2149_v50 = vadd.f32 %v2147_v48, %v3572_v44 }
0x1d9d   :  { %v2158_v1 = vrot.slane %v2156_v0, 3 }
0x1d9e   :  { %v2555_v58 = vmul.f32 -1.442695, %v2149_v50 }
0x1da0   :  { %2983 = vpow2.f32 %v2555_v58 }
0x1daa   :  { %v2984_v56 = vpop.eup %2983 }
0x1dab   :  { %v2153_v59 = vadd.f32 1.0, %v2984_v56 }
0x1dad   :  { %2985 = vrcp.f32 %v2153_v59 }
0x1db7   :  { %v2986_v9 = vpop.eup %2985 }
0x1db8   :  { %v2160_v60 = vmul.f32 %v2986_v9, %v2158_v1  ;;  %v2163_v11 = vsub.f32 1.0, %v2986_v9  ;;  %v2171_v2 = vmul.f32 %v2986_v9, %v2169_v61 }
0x1dba   :  { %v2161_v12 = vadd.f32 %v2160_v60, %v3580_v63 }
0x1dbc   :  { %2987 = vtanh.f32 %v2161_v12 }
0x1dc6   :  { %v2988_v17 = vpop.eup %2987 }
0x1dc7   :  { %2165 = vrot.lane.b32.xlu0 %v2988_v17, %s3029_s26 }
0x1e39   :  { %v2166_v62 = vpop.permute.xlu0 %2165 }
0x1e3a   :  { %v2168_v4 = vmul.f32 %v2166_v62, %v2163_v11 }
0x1e3c   :  { %v2172_v5 = vadd.f32 %v2171_v2, %v2168_v4 }
0x1e3e   :  { %v2178_v8 = vrot.slane %v2172_v5, 5  ;;  %v2277_v42 = vrot.slane %v2172_v5, 7 }
0x1e40   :  { %2179 = vrot.lane.b32.xlu1 %v2178_v8, %s3029_s26 }
0x1eb2   :  { %v2180_v52 = vpop.permute.xlu1 %2179 }
0x1eb3   :  { %2556 = vmatmul.mubr.msk.f32.vlgmr.msra.gmra.mrb[18].mxu0 %vm386_vm7, %v2180_v52 }
0x1eb4   :  { %2589 = vmatprep.mubr.msk.f32.mxu0 %vm3028_vm0, %v3027_v6  ;;  %vm2482_vm0 = vcmask 517120  }
0x1f86   :  { %v2249_v28 = vpop.f32.mrb[18].mxu0 }
0x1f87   :  { %v2255_v10 = vrot.slane %v2249_v28, 2  ;;  %v2251_v13 = vpop.f32.mrb[19].mxu0 }
0x1f88   :  { %v2264_v20 = vadd.f32 %v2251_v13, %v3575_v53 }
0x1f89   :  { %v2257_v14 = vadd.f32 %v2255_v10, %v3572_v44 }
0x1f8a   :  { %v2266_v15 = vrot.slane %v2264_v20, 2 }
0x1f8b   :  { %v2557_v3 = vmul.f32 -1.442695, %v2257_v14 }
0x1f8d   :  { %2989 = vpow2.f32 %v2557_v3 }
0x1f97   :  { %v2990_v19 = vpop.eup %2989 }
0x1f98   :  { %v2261_v55 = vadd.f32 1.0, %v2990_v19 }
0x1f9a   :  { %2991 = vrcp.f32 %v2261_v55 }
0x1fa4   :  { %v2992_v16 = vpop.eup %2991 }
0x1fa5   :  { %v2268_v7 = vmul.f32 %v2992_v16, %v2266_v15  ;;  %v2271_v6 = vsub.f32 1.0, %v2992_v16  ;;  %v2279_v47 = vmul.f32 %v2992_v16, %v2277_v42 }
0x1fa7   :  { %v2269_v25 = vadd.f32 %v2268_v7, %v3580_v63 }
0x1fa9   :  { %2993 = vtanh.f32 %v2269_v25 }
0x1fb3   :  { %v2994_v26 = vpop.eup %2993 }
0x1fb4   :  { %2273 = vrot.lane.b32.xlu0 %v2994_v26, %s3029_s26 }
0x2026   :  { %v2274_v23 = vpop.permute.xlu0 %2273 }
0x2027   :  { %v2276_v51 = vmul.f32 %v2274_v23, %v2271_v6 }
0x2029   :  { %v2280_v54 = vadd.f32 %v2279_v47, %v2276_v51 }
0x202b   :  { %v2286_v24 = vrot.slane %v2280_v54, 6  ;;  %v2385_v48 = vrot.slane %v2280_v54, 7 }
0x202d   :  { %2287 = vrot.lane.b32.xlu1 %v2286_v24, %s3029_s26 }
0x2031   :  { %1742 = vrot.lane.b32.xlu1 %v3600_v29, %s3029_s26 }
0x2035   :  { %1958 = vrot.lane.b32.xlu1 %v3638_v22, %s3029_s26 }
0x2039   :  { %2174 = vrot.lane.b32.xlu1 %v2172_v5, %s3029_s26 }
0x209f   :  { %v2288_v30 = vpop.permute.xlu1 %2287 }
0x20a0   :  { %2558 = vmatmul.mubr.msk.f32.vlgmr.msra.gmra.mrb[20].mxu1 %vm386_vm7, %v2288_v30 }
0x20a3   :  { %v1743_v31 = vpop.permute.xlu1 %1742 }
0x20a4   :  { %1745 = vst.msk [vmem:[#allocation3] sm:$0x2] %vm598_vm8, %v1743_v31 }
0x20a7   :  { %v1959_v32 = vpop.permute.xlu1 %1958 }
0x20a8   :  { %1961 = vst.msk [vmem:[#allocation3] sm:$0x8] %vm816_vm9, %v1959_v32 }
0x20ab   :  { %v2175_v33 = vpop.permute.xlu1 %2174 }
0x20ac   :  { %2177 = vst.msk [vmem:[#allocation3] sm:$0x20] %vm1034_vm10, %v2175_v33 }
0x2173   :  { %v2357_v34 = vpop.f32.mrb[20].mxu1 }
0x2174   :  { %v2363_v35 = vrot.slane %v2357_v34, 1  ;;  %v2359_v29 = vpop.f32.mrb[21].mxu1 }
0x2175   :  { %v2372_v39 = vadd.f32 %v2359_v29, %v3575_v53 }
0x2176   :  { %v2365_v36 = vadd.f32 %v2363_v35, %v3572_v44 }
0x2177   :  { %v2374_v27 = vrot.slane %v2372_v39, 1 }
0x2178   :  { %v2559_v22 = vmul.f32 -1.442695, %v2365_v36 }
0x217a   :  { %2995 = vpow2.f32 %v2559_v22 }
0x2184   :  { %v2996_v18 = vpop.eup %2995 }
0x2185   :  { %v2369_v37 = vadd.f32 1.0, %v2996_v18 }
0x2187   :  { %2997 = vrcp.f32 %v2369_v37 }
0x2191   :  { %v2998_v40 = vpop.eup %2997 }
0x2192   :  { %v2376_v43 = vmul.f32 %v2998_v40, %v2374_v27  ;;  %v2379_v44 = vsub.f32 1.0, %v2998_v40  ;;  %v2387_v49 = vmul.f32 %v2998_v40, %v2385_v48 }
0x2194   :  { %v2377_v45 = vadd.f32 %v2376_v43, %v3580_v63  ;;  %v2472_v63 = vrot.slane %v3356_v21, 7 }
0x2196   :  { %2999 = vtanh.f32 %v2377_v45 }
0x21a0   :  { %v3000_v46 = vpop.eup %2999 }
0x21a1   :  { %2381 = vrot.lane.b32.xlu0 %v3000_v46, %s3029_s26 }
0x21a5   :  { %1850 = vrot.lane.b32.xlu0 %v3619_v57, %s3029_s26 }
0x21a9   :  { %2066 = vrot.lane.b32.xlu0 %v3657_v41, %s3029_s26 }
0x21ad   :  { %2282 = vrot.lane.b32.xlu0 %v2280_v54, %s3029_s26 }
0x2213   :  { %v2382_v53 = vpop.permute.xlu0 %2381 }
0x2214   :  { %v2384_v50 = vmul.f32 %v2382_v53, %v2379_v44 }
0x2216   :  { %v2388_v58 = vadd.f32 %v2387_v49, %v2384_v50 }
0x2217   :  { %v1851_v56 = vpop.permute.xlu0 %1850 }
0x2218   :  { %v2474_v59 = vrot.slane %v2388_v58, 6  ;;  %1853 = vst.msk [vmem:[#allocation3] sm:$0x4] %vm707_vm11, %v1851_v56  ;;  %2390 = vrot.lane.b32.xlu1 %v2388_v58, %s3029_s26 }
0x221a   :  { %v2477_v57 = vsel %vm2476_vm15, %v2472_v63, %v2474_v59 }
0x221b   :  { %v2067_v0 = vpop.permute.xlu0 %2066 }
0x221c   :  { %2069 = vst.msk [vmem:[#allocation3] sm:$0x10] %vm925_vm12, %v2067_v0  ;;  %2479 = vrot.lane.b32.xlu1 %v2477_v57, %s3029_s26  ;;  %s3031_s26 = smov [#allocation4]  }
0x221d   :  { %s2490_s1 = sshll.u32 %s3031_s26, 4  ;;  %s2491_s1 = int_to_ptr.vmem [resolvable:$true] %s2490_s1 }
0x221e   :  { %s3001_s30 = scalar_lea.vmem %s2491_s1, 128  ;;  %p3006_p1 = scmp.lt.s32.totalorder %s2491_s1, %s2491_s1 }
0x221f   :  { %v2283_v41 = vpop.permute.xlu0 %2282  ;;  %p3002_p0 = scmp.ne.s32.totalorder %s2491_s1, %s3001_s30  ;;  %p3007_p2 = scmp.lt.s32.totalorder %s3001_s30, %s3001_s30 }
0x2220   :  { %2285 = vst.msk [vmem:[#allocation3] sm:$0x40] %vm1143_vm13, %v2283_v41 }
0x2221   :  { %p3008_p3 = por %p3007_p2, %p3006_p1 }
0x2223   :  { %p3009_p4 = pnand %p3008_p3, %p3002_p0 }
0x228a   :  { %v2391_v1 = vpop.permute.xlu1 %2390 }
0x228b   :  { %2393 = vst.msk [vmem:[#allocation3] sm:$0x80] %vm1252_vm14, %v2391_v1 }
0x228e   :  { %v2480_v9 = vpop.permute.xlu1 %2479 }
0x228f   :  { %2483 = vst.msk [vmem:[%s3733_s7] sm:$0x3] %vm2482_vm0, %v2480_v9 }
0x2292   :  { %v2394_v21 = vld [vmem:[#allocation3] sm:$0xff] }
0x2293   :  { %2588 = vmatpush3.msra.mxu0 %v2394_v21 }
0x2294   :  { %2590 = vmatmul.mubr.msk.f32.vlgmr.msra.gmra.mrb[20].mxu0 %vm125_vm5, %v3142_v38 }
0x2367   :  { %v2461_v60 = vpop.f32.mrb[20].mxu0 }
0x2368   :  { %2466 = vrot.lane.b32.xlu0 %v2461_v60, %s3030_s2  ;;  %v2591_v12 = vpop.f32.mrb[21].mxu0 }
0x23da   :  { %v2467_v17 = vpop.permute.xlu0 %2466 }
0x23db   :  { %v2469_v11 = vadd.f32 %v2467_v17, %v2394_v21 }
0x23dd   :  { %2471 = vst.msk [vmem:[#allocation4] sm:$0xff] %vm2470_vm1, %v2469_v11 }
0x23de   :  { %3012 = shalt.err (!%p3009_p4)
}
0x23df   :  { %s3013_s9 = scalar_lea.hbm %s3732_s6, 128 }
0x23e0   :  { %p3014_p5 = scmp.ne.s32.totalorder %s3732_s6, %s3013_s9  ;;  %p3017_p6 = scmp.lt.u32.totalorder %s3013_s9, %s3732_s6 }
0x23e2   :  { %p3019_p7 = pnand %p3017_p6, %p3014_p5 }
0x23e4   :  { %3022 = shalt.err (!%p3019_p7)
}
0x23e5   :  { %2493 = dma.vmem_to_hbm [thread:$0]  %s2491_s1, 128, %s3732_s6, [#allocation5]  }
0x23e6   :  { %3023 = dma.done.wait [#allocation5], 128  }
0x23e7   :  { %3024 = vsyncadd [#allocation5], 4294967168 }
0x23e8   :  { %2501 = vsyncpa [#allocation5], 1 }

</bundles_post_ra>
